<compile_context>
chip_gen: v5e
topology: v5e:2x2
jax: 0.10.0
libtpu: 0.0.40
codegen_flags: <defaults>
</compile_context>

<pallas_src>
import functools

import jax
import jax.numpy as jnp
from jax.experimental import pallas as pl
from jax.experimental.pallas import tpu as pltpu


# ------------------------------ fused kernel --------------------------------

def _csp_fused_kernel(x_ref, w_stem_ref, b_stem_ref, w3_ref, b3_ref,
                      w_dw_ref, b_dw_ref, w_pw_ref, b_pw_ref,
                      w_fm_ref, w_fs_ref, b_f_ref, o_ref, *, H, W, mid):
    L = W * mid
    f32 = jnp.float32

    def shift_rows(v, d):
        # rows_shifted[h, :] = v[h + d, :] if 0 <= h + d < H else 0   (d static)
        if d == 0:
            return v
        rolled = pltpu.roll(v, (-d) % H, axis=0)            # sublane rotate (XLU)
        row = jax.lax.broadcasted_iota(jnp.int32, (H, L), 0)
        return jnp.where((row + d >= 0) & (row + d < H), rolled, 0.0)

    x = x_ref[0]                                            # (H, W*Cin)

    # main + short 1x1 stems fused into ONE block-diagonal matmul (K = W*Cin).
    stem = jnp.dot(x, w_stem_ref[...], preferred_element_type=f32)
    stem = jnp.maximum(stem + b_stem_ref[...], 0.0)         # (H, 2*W*mid)
    x_main = stem[:, :L]                                    # packed (H, W*mid)
    x_short = stem[:, L:]

    # 3x3 conv (mid -> mid): 3 banded matmuls (one per dy tap).  The w-direction
    # zero padding is baked into the banded matrices; h padding via zeroed rows.
    acc = jnp.zeros((H, L), f32)
    for dy in range(3):
        acc = acc + jnp.dot(shift_rows(x_main, dy - 1), w3_ref[dy],
                            preferred_element_type=f32)
    h = jnp.maximum(acc + b3_ref[...], 0.0)

    # 5x5 depthwise conv: lane rolls (XLU) + full-lane VPU MACs; the w-boundary
    # mask is pre-multiplied into the packed per-tap weights, so wrapped lanes
    # contribute exactly zero.
    wdw = w_dw_ref[...]                                     # (25, W*mid)
    acc = jnp.zeros((H, L), f32)
    for dy in range(5):
        rows = shift_rows(h, dy - 2)
        for dx in range(5):
            tap = rows if dx == 2 else pltpu.roll(rows, ((2 - dx) * mid) % L, axis=1)
            idx = dy * 5 + dx
            acc = acc + tap * wdw[idx:idx + 1, :]
    dwo = jnp.maximum(acc + b_dw_ref[...], 0.0)

    # 1x1 pointwise conv + residual add (CSPNeXtBlock identity path).
    pw = jnp.dot(dwo, w_pw_ref[...], preferred_element_type=f32)
    x_main = jnp.maximum(pw + b_pw_ref[...], 0.0) + x_main

    # final 1x1 conv over concat(main, short): split-weight matmuls, no concat.
    out = jnp.dot(x_main, w_fm_ref[...], preferred_element_type=f32)
    out = out + jnp.dot(x_short, w_fs_ref[...], preferred_element_type=f32)
    o_ref[0] = jnp.maximum(out + b_f_ref[...], 0.0)         # (H, W*Cout) lane-dense


# ------------------------- packed weight construction -----------------------

def _pack_csp_weights(P, W):
    """Re-express all convs as lane-packed matmul weights (done once, tiny)."""
    mid = P["mid"]
    f32 = jnp.float32
    eyeW = jnp.eye(W, dtype=f32)

    def pw_mat(w_pt):                       # (Cout, Cin, 1, 1) -> (Cin, Cout)
        return jnp.transpose(w_pt[:, :, 0, 0], (1, 0)).astype(f32)

    out = {}
    # merged main|short stem: block-diagonal (W*Cin, 2*W*mid)
    out["w_stem"] = jnp.concatenate(
        [jnp.kron(eyeW, pw_mat(P["w_main"])), jnp.kron(eyeW, pw_mat(P["w_short"]))],
        axis=1)
    out["b_stem"] = jnp.concatenate(
        [jnp.tile(P["b_main"], W), jnp.tile(P["b_short"], W)]).reshape(1, -1)

    # 3x3 conv -> 3 banded (W*mid, W*mid) matrices (one per dy tap).
    k3 = jnp.transpose(P["w_c1"], (2, 3, 1, 0)).astype(f32)          # (3,3,Cin,Cout)
    out["w3"] = jnp.stack([
        sum(jnp.kron(jnp.eye(W, k=1 - dx, dtype=f32), k3[dy, dx]) for dx in range(3))
        for dy in range(3)])
    out["b3"] = jnp.tile(P["b_c1"], W).reshape(1, -1)

    # 5x5 depthwise -> 25 masked per-lane weight rows (tap order dy*5 + dx).
    kd = jnp.transpose(P["w_dw"][:, 0], (1, 2, 0)).astype(f32)       # (5,5,mid)
    wcol = jnp.arange(W)
    rows = []
    for dy in range(5):
        for dx in range(5):
            valid = ((wcol + dx - 2 >= 0) & (wcol + dx - 2 < W)).astype(f32)
            rows.append((valid[:, None] * kd[dy, dx][None, :]).reshape(-1))
    out["w_dw"] = jnp.stack(rows)                                     # (25, W*mid)
    out["b_dw"] = jnp.tile(P["b_dw"], W).reshape(1, -1)

    out["w_pw"] = jnp.kron(eyeW, pw_mat(P["w_pw"]))                   # (W*mid, W*mid)
    out["b_pw"] = jnp.tile(P["b_pw"], W).reshape(1, -1)

    wf = P["w_final"][:, :, 0, 0].astype(f32)                         # (Cout, 2*mid)
    out["w_fm"] = jnp.kron(eyeW, wf[:, :mid].T)                       # (W*mid, W*Cout)
    out["w_fs"] = jnp.kron(eyeW, wf[:, mid:].T)
    out["b_f"] = jnp.tile(P["b_final"], W).reshape(1, -1)
    return out


# ------------------------------ forward (Pallas) ----------------------------

def csp_layer_forward(x_nchw, P):
    # NCHW in/out; lane-packed (N, H, W*C) inside.
    x = jnp.transpose(x_nchw, (0, 2, 3, 1)).astype(jnp.float32)       # NHWC
    N, H, W, Cin = x.shape
    mid = P["mid"]
    Cout = P["w_final"].shape[0]
    Lin, Lmid, Lout = W * Cin, W * mid, W * Cout

    pw = _pack_csp_weights(P, W)                                      # wrapper-side, tiny
    x_packed = x.reshape(N, H, Lin)                                   # lane-dense input

    def const(shape):
        return pl.BlockSpec(shape, lambda n, _s=shape: (0,) * len(_s))

    kernel = functools.partial(_csp_fused_kernel, H=H, W=W, mid=mid)
    out = pl.pallas_call(
        kernel,
        out_shape=jax.ShapeDtypeStruct((N, H, Lout), jnp.float32),
        grid=(N,),
        in_specs=[pl.BlockSpec((1, H, Lin), lambda n: (n, 0, 0)),
                  const((Lin, 2 * Lmid)), const((1, 2 * Lmid)),
                  const((3, Lmid, Lmid)), const((1, Lmid)),
                  const((25, Lmid)), const((1, Lmid)),
                  const((Lmid, Lmid)), const((1, Lmid)),
                  const((Lmid, Lout)), const((Lmid, Lout)), const((1, Lout))],
        out_specs=pl.BlockSpec((1, H, Lout), lambda n: (n, 0, 0)),
        compiler_params=pltpu.CompilerParams(
            dimension_semantics=("parallel",)),       # >=2 grid steps for v7x megacore
    )(x_packed, pw["w_stem"], pw["b_stem"], pw["w3"], pw["b3"],
      pw["w_dw"], pw["b_dw"], pw["w_pw"], pw["b_pw"],
      pw["w_fm"], pw["w_fs"], pw["b_f"])

    return jnp.transpose(out.reshape(N, H, W, Cout), (0, 3, 1, 2))    # NCHW


# ----------------------- parameter construction (glue) ----------------------

def _fold_conv_bn(key, cout, cin_per_group, kh, kw):
    """Deterministic conv weight + BatchNorm (eval mode) folded into (w, b)."""
    k1, k2, k3, k4, k5 = jax.random.split(key, 5)
    w = 0.2 * jax.random.normal(k1, (cout, cin_per_group, kh, kw), jnp.float32)
    gamma = 1.0 + 0.1 * jax.random.normal(k2, (cout,), jnp.float32)
    beta = 0.1 * jax.random.normal(k3, (cout,), jnp.float32)
    mean = 0.1 * jax.random.normal(k4, (cout,), jnp.float32)
    var = jax.random.uniform(k5, (cout,), jnp.float32, 0.5, 1.5)
    scale = gamma / jnp.sqrt(var + 1e-3)          # BN eps = 0.001
    return w * scale[:, None, None, None], beta - mean * scale


def make_csp_layer_params(key, in_channels, out_channels, expand_ratio=0.5):
    mid = int(out_channels * expand_ratio)
    ks = jax.random.split(key, 6)
    P = {}
    P["w_main"], P["b_main"] = _fold_conv_bn(ks[0], mid, in_channels, 1, 1)
    P["w_short"], P["b_short"] = _fold_conv_bn(ks[1], mid, in_channels, 1, 1)
    # CSPNeXtBlock(mid, mid, expansion=1.0): conv1 3x3, conv2 = dw5x5 + pw1x1
    P["w_c1"], P["b_c1"] = _fold_conv_bn(ks[2], mid, mid, 3, 3)
    P["w_dw"], P["b_dw"] = _fold_conv_bn(ks[3], mid, 1, 5, 5)
    P["w_pw"], P["b_pw"] = _fold_conv_bn(ks[4], mid, mid, 1, 1)
    P["w_final"], P["b_final"] = _fold_conv_bn(ks[5], out_channels, 2 * mid, 1, 1)
    P["mid"] = mid
    return P


# ------------------------------ pure-JAX reference --------------------------

def _ref_conv(x, w, b, pad, groups=1):
    wh = jnp.transpose(w, (2, 3, 1, 0))    # HWIO
    y = jax.lax.conv_general_dilated(
        x, wh, (1, 1), [(pad, pad), (pad, pad)],
        dimension_numbers=("NHWC", "HWIO", "NHWC"), feature_group_count=groups)
    return jnp.maximum(y + b, 0.0)


def csp_layer_reference(x_nchw, P):
    x = jnp.transpose(x_nchw, (0, 2, 3, 1)).astype(jnp.float32)
    mid = P["mid"]
    xs = _ref_conv(x, P["w_short"], P["b_short"], 0)
    xm = _ref_conv(x, P["w_main"], P["b_main"], 0)
    h = _ref_conv(xm, P["w_c1"], P["b_c1"], 1)
    h = _ref_conv(h, P["w_dw"], P["b_dw"], 2, groups=mid)
    h = _ref_conv(h, P["w_pw"], P["b_pw"], 0)
    xm = h + xm
    xc = jnp.concatenate([xm, xs], axis=-1)
    out = _ref_conv(xc, P["w_final"], P["b_final"], 0)
    return jnp.transpose(out, (0, 3, 1, 2))


# ----------------------------------- main ------------------------------------

if __name__ == "__main__":
    key = jax.random.PRNGKey(0)
    k_x, k_p = jax.random.split(key)

    # CSPLayer(16 -> 16), mid = 8; W*mid = 128 => lane-dense working layout.
    N, C, Hs, Ws = 2, 16, 16, 16
    x = jax.random.normal(k_x, (N, C, Hs, Ws), jnp.float32)
    params = make_csp_layer_params(k_p, in_channels=C, out_channels=C)

    out = jax.block_until_ready(csp_layer_forward(x, params))
    ref = jax.block_until_ready(csp_layer_reference(x, params))

    assert out.shape == (N, C, Hs, Ws), out.shape
    assert jnp.allclose(out, ref, atol=5e-4, rtol=1e-3), (
        float(jnp.max(jnp.abs(out - ref))))
    print("KERNEL_OK")
</pallas_src>

<mosaic_0001>
module attributes {stable_mosaic.version = 11 : i64} {
  func.func @_csp_fused_kernel(%arg0: i32, %arg1: memref<1x16x256xf32, #tpu.memory_space<vmem>>, %arg2: memref<256x256xf32, #tpu.memory_space<vmem>>, %arg3: memref<1x256xf32, #tpu.memory_space<vmem>>, %arg4: memref<3x128x128xf32, #tpu.memory_space<vmem>>, %arg5: memref<1x128xf32, #tpu.memory_space<vmem>>, %arg6: memref<25x128xf32, #tpu.memory_space<vmem>>, %arg7: memref<1x128xf32, #tpu.memory_space<vmem>>, %arg8: memref<128x128xf32, #tpu.memory_space<vmem>>, %arg9: memref<1x128xf32, #tpu.memory_space<vmem>>, %arg10: memref<128x256xf32, #tpu.memory_space<vmem>>, %arg11: memref<128x256xf32, #tpu.memory_space<vmem>>, %arg12: memref<1x256xf32, #tpu.memory_space<vmem>>, %arg13: memref<1x16x256xf32, #tpu.memory_space<vmem>>) attributes {dimension_semantics = [#tpu.dimension_semantics<parallel>], iteration_bounds = array<i64: 2>, scalar_prefetch = 0 : i64, scratch_operands = 0 : i64, tpu.core_type = #tpu.core_type<tc>, window_params = [{transform_indices = @transform_0, window_bounds = array<i64: 1, 16, 256>}, {pipeline_mode = #tpu.pipeline_mode<synchronous>, transform_indices = @transform_1, window_bounds = array<i64: 256, 256>}, {pipeline_mode = #tpu.pipeline_mode<synchronous>, transform_indices = @transform_2, window_bounds = array<i64: 1, 256>}, {pipeline_mode = #tpu.pipeline_mode<synchronous>, transform_indices = @transform_3, window_bounds = array<i64: 3, 128, 128>}, {pipeline_mode = #tpu.pipeline_mode<synchronous>, transform_indices = @transform_4, window_bounds = array<i64: 1, 128>}, {pipeline_mode = #tpu.pipeline_mode<synchronous>, transform_indices = @transform_5, window_bounds = array<i64: 25, 128>}, {pipeline_mode = #tpu.pipeline_mode<synchronous>, transform_indices = @transform_6, window_bounds = array<i64: 1, 128>}, {pipeline_mode = #tpu.pipeline_mode<synchronous>, transform_indices = @transform_7, window_bounds = array<i64: 128, 128>}, {pipeline_mode = #tpu.pipeline_mode<synchronous>, transform_indices = @transform_8, window_bounds = array<i64: 1, 128>}, {pipeline_mode = #tpu.pipeline_mode<synchronous>, transform_indices = @transform_9, window_bounds = array<i64: 128, 256>}, {pipeline_mode = #tpu.pipeline_mode<synchronous>, transform_indices = @transform_10, window_bounds = array<i64: 128, 256>}, {pipeline_mode = #tpu.pipeline_mode<synchronous>, transform_indices = @transform_11, window_bounds = array<i64: 1, 256>}, {transform_indices = @transform_12, window_bounds = array<i64: 1, 16, 256>}]} {
    %c0 = arith.constant 0 : index
    %c0_0 = arith.constant 0 : index
    %c0_1 = arith.constant 0 : index
    %0 = vector.load %arg1[%c0, %c0_0, %c0_1] : memref<1x16x256xf32, #tpu.memory_space<vmem>>, vector<1x16x256xf32>
    %1 = vector.shape_cast %0 : vector<1x16x256xf32> to vector<16x256xf32>
    %c0_2 = arith.constant 0 : index
    %c0_3 = arith.constant 0 : index
    %2 = vector.load %arg2[%c0_2, %c0_3] : memref<256x256xf32, #tpu.memory_space<vmem>>, vector<256x256xf32>
    %cst = arith.constant dense<0.000000e+00> : vector<16x256xf32>
    %3 = tpu.matmul %1, %2, %cst {dimension_numbers = #tpu.dot_dimension_numbers<[1], [0], [0], [1], [0, 0, 1, 1], [], []>} : vector<16x256xf32>, vector<256x256xf32>, vector<16x256xf32> -> vector<16x256xf32>
    %c0_4 = arith.constant 0 : index
    %c0_5 = arith.constant 0 : index
    %4 = vector.load %arg3[%c0_4, %c0_5] : memref<1x256xf32, #tpu.memory_space<vmem>>, vector<1x256xf32>
    %5 = vector.broadcast %4 : vector<1x256xf32> to vector<16x256xf32>
    %6 = arith.addf %3, %5 : vector<16x256xf32>
    %cst_6 = arith.constant 0.000000e+00 : f32
    %7 = vector.broadcast %cst_6 : f32 to vector<16x256xf32>
    %8 = arith.maximumf %6, %7 : vector<16x256xf32>
    %9 = vector.extract_strided_slice %8 {offsets = [0, 0], sizes = [16, 128], strides = [1, 1]} : vector<16x256xf32> to vector<16x128xf32>
    %10 = vector.extract_strided_slice %8 {offsets = [0, 128], sizes = [16, 128], strides = [1, 1]} : vector<16x256xf32> to vector<16x128xf32>
    %cst_7 = arith.constant 0.000000e+00 : f32
    %11 = vector.broadcast %cst_7 : f32 to vector<16x128xf32>
    %c1_i32 = arith.constant 1 : i32
    %12 = tpu.dynamic_rotate %9 by %c1_i32 dim 0 : vector<16x128xf32>, i32 -> vector<16x128xf32>
    %13 = tpu.iota {dimensions = array<i32: 0>} : vector<16x128xi32>
    %c-1_i32 = arith.constant -1 : i32
    %14 = vector.broadcast %c-1_i32 : i32 to vector<16x128xi32>
    %15 = arith.addi %13, %14 : vector<16x128xi32>
    %c0_i32 = arith.constant 0 : i32
    %16 = vector.broadcast %c0_i32 : i32 to vector<16x128xi32>
    %17 = arith.cmpi sge, %15, %16 : vector<16x128xi32>
    %c-1_i32_8 = arith.constant -1 : i32
    %18 = vector.broadcast %c-1_i32_8 : i32 to vector<16x128xi32>
    %19 = arith.addi %13, %18 : vector<16x128xi32>
    %c16_i32 = arith.constant 16 : i32
    %20 = vector.broadcast %c16_i32 : i32 to vector<16x128xi32>
    %21 = arith.cmpi slt, %19, %20 : vector<16x128xi32>
    %22 = arith.andi %17, %21 : vector<16x128xi1>
    %cst_9 = arith.constant 0.000000e+00 : f32
    %23 = vector.broadcast %cst_9 : f32 to vector<16x128xf32>
    %24 = arith.select %22, %12, %23 : vector<16x128xi1>, vector<16x128xf32>
    %c0_10 = arith.constant 0 : index
    %c0_11 = arith.constant 0 : index
    %c0_12 = arith.constant 0 : index
    %25 = vector.load %arg4[%c0_10, %c0_11, %c0_12] : memref<3x128x128xf32, #tpu.memory_space<vmem>>, vector<1x128x128xf32>
    %26 = vector.shape_cast %25 : vector<1x128x128xf32> to vector<128x128xf32>
    %cst_13 = arith.constant dense<0.000000e+00> : vector<16x128xf32>
    %27 = tpu.matmul %24, %26, %cst_13 {dimension_numbers = #tpu.dot_dimension_numbers<[1], [0], [0], [1], [0, 0, 1, 1], [], []>} : vector<16x128xf32>, vector<128x128xf32>, vector<16x128xf32> -> vector<16x128xf32>
    %28 = arith.addf %11, %27 : vector<16x128xf32>
    %c1 = arith.constant 1 : index
    %c0_14 = arith.constant 0 : index
    %c0_15 = arith.constant 0 : index
    %29 = vector.load %arg4[%c1, %c0_14, %c0_15] : memref<3x128x128xf32, #tpu.memory_space<vmem>>, vector<1x128x128xf32>
    %30 = vector.shape_cast %29 : vector<1x128x128xf32> to vector<128x128xf32>
    %cst_16 = arith.constant dense<0.000000e+00> : vector<16x128xf32>
    %31 = tpu.matmul %9, %30, %cst_16 {dimension_numbers = #tpu.dot_dimension_numbers<[1], [0], [0], [1], [0, 0, 1, 1], [], []>} : vector<16x128xf32>, vector<128x128xf32>, vector<16x128xf32> -> vector<16x128xf32>
    %32 = arith.addf %28, %31 : vector<16x128xf32>
    %c15_i32 = arith.constant 15 : i32
    %33 = tpu.dynamic_rotate %9 by %c15_i32 dim 0 : vector<16x128xf32>, i32 -> vector<16x128xf32>
    %34 = tpu.iota {dimensions = array<i32: 0>} : vector<16x128xi32>
    %c1_i32_17 = arith.constant 1 : i32
    %35 = vector.broadcast %c1_i32_17 : i32 to vector<16x128xi32>
    %36 = arith.addi %34, %35 : vector<16x128xi32>
    %c0_i32_18 = arith.constant 0 : i32
    %37 = vector.broadcast %c0_i32_18 : i32 to vector<16x128xi32>
    %38 = arith.cmpi sge, %36, %37 : vector<16x128xi32>
    %c1_i32_19 = arith.constant 1 : i32
    %39 = vector.broadcast %c1_i32_19 : i32 to vector<16x128xi32>
    %40 = arith.addi %34, %39 : vector<16x128xi32>
    %c16_i32_20 = arith.constant 16 : i32
    %41 = vector.broadcast %c16_i32_20 : i32 to vector<16x128xi32>
    %42 = arith.cmpi slt, %40, %41 : vector<16x128xi32>
    %43 = arith.andi %38, %42 : vector<16x128xi1>
    %cst_21 = arith.constant 0.000000e+00 : f32
    %44 = vector.broadcast %cst_21 : f32 to vector<16x128xf32>
    %45 = arith.select %43, %33, %44 : vector<16x128xi1>, vector<16x128xf32>
    %c2 = arith.constant 2 : index
    %c0_22 = arith.constant 0 : index
    %c0_23 = arith.constant 0 : index
    %46 = vector.load %arg4[%c2, %c0_22, %c0_23] : memref<3x128x128xf32, #tpu.memory_space<vmem>>, vector<1x128x128xf32>
    %47 = vector.shape_cast %46 : vector<1x128x128xf32> to vector<128x128xf32>
    %cst_24 = arith.constant dense<0.000000e+00> : vector<16x128xf32>
    %48 = tpu.matmul %45, %47, %cst_24 {dimension_numbers = #tpu.dot_dimension_numbers<[1], [0], [0], [1], [0, 0, 1, 1], [], []>} : vector<16x128xf32>, vector<128x128xf32>, vector<16x128xf32> -> vector<16x128xf32>
    %49 = arith.addf %32, %48 : vector<16x128xf32>
    %c0_25 = arith.constant 0 : index
    %c0_26 = arith.constant 0 : index
    %50 = vector.load %arg5[%c0_25, %c0_26] : memref<1x128xf32, #tpu.memory_space<vmem>>, vector<1x128xf32>
    %51 = vector.broadcast %50 : vector<1x128xf32> to vector<16x128xf32>
    %52 = arith.addf %49, %51 : vector<16x128xf32>
    %cst_27 = arith.constant 0.000000e+00 : f32
    %53 = vector.broadcast %cst_27 : f32 to vector<16x128xf32>
    %54 = arith.maximumf %52, %53 : vector<16x128xf32>
    %c0_28 = arith.constant 0 : index
    %c0_29 = arith.constant 0 : index
    %55 = vector.load %arg6[%c0_28, %c0_29] : memref<25x128xf32, #tpu.memory_space<vmem>>, vector<25x128xf32>
    %cst_30 = arith.constant 0.000000e+00 : f32
    %56 = vector.broadcast %cst_30 : f32 to vector<16x128xf32>
    %c2_i32 = arith.constant 2 : i32
    %57 = tpu.dynamic_rotate %54 by %c2_i32 dim 0 : vector<16x128xf32>, i32 -> vector<16x128xf32>
    %58 = tpu.iota {dimensions = array<i32: 0>} : vector<16x128xi32>
    %c-2_i32 = arith.constant -2 : i32
    %59 = vector.broadcast %c-2_i32 : i32 to vector<16x128xi32>
    %60 = arith.addi %58, %59 : vector<16x128xi32>
    %c0_i32_31 = arith.constant 0 : i32
    %61 = vector.broadcast %c0_i32_31 : i32 to vector<16x128xi32>
    %62 = arith.cmpi sge, %60, %61 : vector<16x128xi32>
    %c-2_i32_32 = arith.constant -2 : i32
    %63 = vector.broadcast %c-2_i32_32 : i32 to vector<16x128xi32>
    %64 = arith.addi %58, %63 : vector<16x128xi32>
    %c16_i32_33 = arith.constant 16 : i32
    %65 = vector.broadcast %c16_i32_33 : i32 to vector<16x128xi32>
    %66 = arith.cmpi slt, %64, %65 : vector<16x128xi32>
    %67 = arith.andi %62, %66 : vector<16x128xi1>
    %cst_34 = arith.constant 0.000000e+00 : f32
    %68 = vector.broadcast %cst_34 : f32 to vector<16x128xf32>
    %69 = arith.select %67, %57, %68 : vector<16x128xi1>, vector<16x128xf32>
    %c16_i32_35 = arith.constant 16 : i32
    %70 = tpu.dynamic_rotate %69 by %c16_i32_35 dim 1 : vector<16x128xf32>, i32 -> vector<16x128xf32>
    %71 = vector.extract_strided_slice %55 {offsets = [0, 0], sizes = [1, 128], strides = [1, 1]} : vector<25x128xf32> to vector<1x128xf32>
    %72 = vector.broadcast %71 : vector<1x128xf32> to vector<16x128xf32>
    %73 = arith.mulf %70, %72 : vector<16x128xf32>
    %74 = arith.addf %56, %73 : vector<16x128xf32>
    %c8_i32 = arith.constant 8 : i32
    %75 = tpu.dynamic_rotate %69 by %c8_i32 dim 1 : vector<16x128xf32>, i32 -> vector<16x128xf32>
    %76 = vector.extract_strided_slice %55 {offsets = [1, 0], sizes = [1, 128], strides = [1, 1]} : vector<25x128xf32> to vector<1x128xf32>
    %77 = vector.broadcast %76 : vector<1x128xf32> to vector<16x128xf32>
    %78 = arith.mulf %75, %77 : vector<16x128xf32>
    %79 = arith.addf %74, %78 : vector<16x128xf32>
    %80 = vector.extract_strided_slice %55 {offsets = [2, 0], sizes = [1, 128], strides = [1, 1]} : vector<25x128xf32> to vector<1x128xf32>
    %81 = vector.broadcast %80 : vector<1x128xf32> to vector<16x128xf32>
    %82 = arith.mulf %69, %81 : vector<16x128xf32>
    %83 = arith.addf %79, %82 : vector<16x128xf32>
    %c120_i32 = arith.constant 120 : i32
    %84 = tpu.dynamic_rotate %69 by %c120_i32 dim 1 : vector<16x128xf32>, i32 -> vector<16x128xf32>
    %85 = vector.extract_strided_slice %55 {offsets = [3, 0], sizes = [1, 128], strides = [1, 1]} : vector<25x128xf32> to vector<1x128xf32>
    %86 = vector.broadcast %85 : vector<1x128xf32> to vector<16x128xf32>
    %87 = arith.mulf %84, %86 : vector<16x128xf32>
    %88 = arith.addf %83, %87 : vector<16x128xf32>
    %c112_i32 = arith.constant 112 : i32
    %89 = tpu.dynamic_rotate %69 by %c112_i32 dim 1 : vector<16x128xf32>, i32 -> vector<16x128xf32>
    %90 = vector.extract_strided_slice %55 {offsets = [4, 0], sizes = [1, 128], strides = [1, 1]} : vector<25x128xf32> to vector<1x128xf32>
    %91 = vector.broadcast %90 : vector<1x128xf32> to vector<16x128xf32>
    %92 = arith.mulf %89, %91 : vector<16x128xf32>
    %93 = arith.addf %88, %92 : vector<16x128xf32>
    %c1_i32_36 = arith.constant 1 : i32
    %94 = tpu.dynamic_rotate %54 by %c1_i32_36 dim 0 : vector<16x128xf32>, i32 -> vector<16x128xf32>
    %95 = tpu.iota {dimensions = array<i32: 0>} : vector<16x128xi32>
    %c-1_i32_37 = arith.constant -1 : i32
    %96 = vector.broadcast %c-1_i32_37 : i32 to vector<16x128xi32>
    %97 = arith.addi %95, %96 : vector<16x128xi32>
    %c0_i32_38 = arith.constant 0 : i32
    %98 = vector.broadcast %c0_i32_38 : i32 to vector<16x128xi32>
    %99 = arith.cmpi sge, %97, %98 : vector<16x128xi32>
    %c-1_i32_39 = arith.constant -1 : i32
    %100 = vector.broadcast %c-1_i32_39 : i32 to vector<16x128xi32>
    %101 = arith.addi %95, %100 : vector<16x128xi32>
    %c16_i32_40 = arith.constant 16 : i32
    %102 = vector.broadcast %c16_i32_40 : i32 to vector<16x128xi32>
    %103 = arith.cmpi slt, %101, %102 : vector<16x128xi32>
    %104 = arith.andi %99, %103 : vector<16x128xi1>
    %cst_41 = arith.constant 0.000000e+00 : f32
    %105 = vector.broadcast %cst_41 : f32 to vector<16x128xf32>
    %106 = arith.select %104, %94, %105 : vector<16x128xi1>, vector<16x128xf32>
    %c16_i32_42 = arith.constant 16 : i32
    %107 = tpu.dynamic_rotate %106 by %c16_i32_42 dim 1 : vector<16x128xf32>, i32 -> vector<16x128xf32>
    %108 = vector.extract_strided_slice %55 {offsets = [5, 0], sizes = [1, 128], strides = [1, 1]} : vector<25x128xf32> to vector<1x128xf32>
    %109 = vector.broadcast %108 : vector<1x128xf32> to vector<16x128xf32>
    %110 = arith.mulf %107, %109 : vector<16x128xf32>
    %111 = arith.addf %93, %110 : vector<16x128xf32>
    %c8_i32_43 = arith.constant 8 : i32
    %112 = tpu.dynamic_rotate %106 by %c8_i32_43 dim 1 : vector<16x128xf32>, i32 -> vector<16x128xf32>
    %113 = vector.extract_strided_slice %55 {offsets = [6, 0], sizes = [1, 128], strides = [1, 1]} : vector<25x128xf32> to vector<1x128xf32>
    %114 = vector.broadcast %113 : vector<1x128xf32> to vector<16x128xf32>
    %115 = arith.mulf %112, %114 : vector<16x128xf32>
    %116 = arith.addf %111, %115 : vector<16x128xf32>
    %117 = vector.extract_strided_slice %55 {offsets = [7, 0], sizes = [1, 128], strides = [1, 1]} : vector<25x128xf32> to vector<1x128xf32>
    %118 = vector.broadcast %117 : vector<1x128xf32> to vector<16x128xf32>
    %119 = arith.mulf %106, %118 : vector<16x128xf32>
    %120 = arith.addf %116, %119 : vector<16x128xf32>
    %c120_i32_44 = arith.constant 120 : i32
    %121 = tpu.dynamic_rotate %106 by %c120_i32_44 dim 1 : vector<16x128xf32>, i32 -> vector<16x128xf32>
    %122 = vector.extract_strided_slice %55 {offsets = [8, 0], sizes = [1, 128], strides = [1, 1]} : vector<25x128xf32> to vector<1x128xf32>
    %123 = vector.broadcast %122 : vector<1x128xf32> to vector<16x128xf32>
    %124 = arith.mulf %121, %123 : vector<16x128xf32>
    %125 = arith.addf %120, %124 : vector<16x128xf32>
    %c112_i32_45 = arith.constant 112 : i32
    %126 = tpu.dynamic_rotate %106 by %c112_i32_45 dim 1 : vector<16x128xf32>, i32 -> vector<16x128xf32>
    %127 = vector.extract_strided_slice %55 {offsets = [9, 0], sizes = [1, 128], strides = [1, 1]} : vector<25x128xf32> to vector<1x128xf32>
    %128 = vector.broadcast %127 : vector<1x128xf32> to vector<16x128xf32>
    %129 = arith.mulf %126, %128 : vector<16x128xf32>
    %130 = arith.addf %125, %129 : vector<16x128xf32>
    %c16_i32_46 = arith.constant 16 : i32
    %131 = tpu.dynamic_rotate %54 by %c16_i32_46 dim 1 : vector<16x128xf32>, i32 -> vector<16x128xf32>
    %132 = vector.extract_strided_slice %55 {offsets = [10, 0], sizes = [1, 128], strides = [1, 1]} : vector<25x128xf32> to vector<1x128xf32>
    %133 = vector.broadcast %132 : vector<1x128xf32> to vector<16x128xf32>
    %134 = arith.mulf %131, %133 : vector<16x128xf32>
    %135 = arith.addf %130, %134 : vector<16x128xf32>
    %c8_i32_47 = arith.constant 8 : i32
    %136 = tpu.dynamic_rotate %54 by %c8_i32_47 dim 1 : vector<16x128xf32>, i32 -> vector<16x128xf32>
    %137 = vector.extract_strided_slice %55 {offsets = [11, 0], sizes = [1, 128], strides = [1, 1]} : vector<25x128xf32> to vector<1x128xf32>
    %138 = vector.broadcast %137 : vector<1x128xf32> to vector<16x128xf32>
    %139 = arith.mulf %136, %138 : vector<16x128xf32>
    %140 = arith.addf %135, %139 : vector<16x128xf32>
    %141 = vector.extract_strided_slice %55 {offsets = [12, 0], sizes = [1, 128], strides = [1, 1]} : vector<25x128xf32> to vector<1x128xf32>
    %142 = vector.broadcast %141 : vector<1x128xf32> to vector<16x128xf32>
    %143 = arith.mulf %54, %142 : vector<16x128xf32>
    %144 = arith.addf %140, %143 : vector<16x128xf32>
    %c120_i32_48 = arith.constant 120 : i32
    %145 = tpu.dynamic_rotate %54 by %c120_i32_48 dim 1 : vector<16x128xf32>, i32 -> vector<16x128xf32>
    %146 = vector.extract_strided_slice %55 {offsets = [13, 0], sizes = [1, 128], strides = [1, 1]} : vector<25x128xf32> to vector<1x128xf32>
    %147 = vector.broadcast %146 : vector<1x128xf32> to vector<16x128xf32>
    %148 = arith.mulf %145, %147 : vector<16x128xf32>
    %149 = arith.addf %144, %148 : vector<16x128xf32>
    %c112_i32_49 = arith.constant 112 : i32
    %150 = tpu.dynamic_rotate %54 by %c112_i32_49 dim 1 : vector<16x128xf32>, i32 -> vector<16x128xf32>
    %151 = vector.extract_strided_slice %55 {offsets = [14, 0], sizes = [1, 128], strides = [1, 1]} : vector<25x128xf32> to vector<1x128xf32>
    %152 = vector.broadcast %151 : vector<1x128xf32> to vector<16x128xf32>
    %153 = arith.mulf %150, %152 : vector<16x128xf32>
    %154 = arith.addf %149, %153 : vector<16x128xf32>
    %c15_i32_50 = arith.constant 15 : i32
    %155 = tpu.dynamic_rotate %54 by %c15_i32_50 dim 0 : vector<16x128xf32>, i32 -> vector<16x128xf32>
    %156 = tpu.iota {dimensions = array<i32: 0>} : vector<16x128xi32>
    %c1_i32_51 = arith.constant 1 : i32
    %157 = vector.broadcast %c1_i32_51 : i32 to vector<16x128xi32>
    %158 = arith.addi %156, %157 : vector<16x128xi32>
    %c0_i32_52 = arith.constant 0 : i32
    %159 = vector.broadcast %c0_i32_52 : i32 to vector<16x128xi32>
    %160 = arith.cmpi sge, %158, %159 : vector<16x128xi32>
    %c1_i32_53 = arith.constant 1 : i32
    %161 = vector.broadcast %c1_i32_53 : i32 to vector<16x128xi32>
    %162 = arith.addi %156, %161 : vector<16x128xi32>
    %c16_i32_54 = arith.constant 16 : i32
    %163 = vector.broadcast %c16_i32_54 : i32 to vector<16x128xi32>
    %164 = arith.cmpi slt, %162, %163 : vector<16x128xi32>
    %165 = arith.andi %160, %164 : vector<16x128xi1>
    %cst_55 = arith.constant 0.000000e+00 : f32
    %166 = vector.broadcast %cst_55 : f32 to vector<16x128xf32>
    %167 = arith.select %165, %155, %166 : vector<16x128xi1>, vector<16x128xf32>
    %c16_i32_56 = arith.constant 16 : i32
    %168 = tpu.dynamic_rotate %167 by %c16_i32_56 dim 1 : vector<16x128xf32>, i32 -> vector<16x128xf32>
    %169 = vector.extract_strided_slice %55 {offsets = [15, 0], sizes = [1, 128], strides = [1, 1]} : vector<25x128xf32> to vector<1x128xf32>
    %170 = vector.broadcast %169 : vector<1x128xf32> to vector<16x128xf32>
    %171 = arith.mulf %168, %170 : vector<16x128xf32>
    %172 = arith.addf %154, %171 : vector<16x128xf32>
    %c8_i32_57 = arith.constant 8 : i32
    %173 = tpu.dynamic_rotate %167 by %c8_i32_57 dim 1 : vector<16x128xf32>, i32 -> vector<16x128xf32>
    %174 = vector.extract_strided_slice %55 {offsets = [16, 0], sizes = [1, 128], strides = [1, 1]} : vector<25x128xf32> to vector<1x128xf32>
    %175 = vector.broadcast %174 : vector<1x128xf32> to vector<16x128xf32>
    %176 = arith.mulf %173, %175 : vector<16x128xf32>
    %177 = arith.addf %172, %176 : vector<16x128xf32>
    %178 = vector.extract_strided_slice %55 {offsets = [17, 0], sizes = [1, 128], strides = [1, 1]} : vector<25x128xf32> to vector<1x128xf32>
    %179 = vector.broadcast %178 : vector<1x128xf32> to vector<16x128xf32>
    %180 = arith.mulf %167, %179 : vector<16x128xf32>
    %181 = arith.addf %177, %180 : vector<16x128xf32>
    %c120_i32_58 = arith.constant 120 : i32
    %182 = tpu.dynamic_rotate %167 by %c120_i32_58 dim 1 : vector<16x128xf32>, i32 -> vector<16x128xf32>
    %183 = vector.extract_strided_slice %55 {offsets = [18, 0], sizes = [1, 128], strides = [1, 1]} : vector<25x128xf32> to vector<1x128xf32>
    %184 = vector.broadcast %183 : vector<1x128xf32> to vector<16x128xf32>
    %185 = arith.mulf %182, %184 : vector<16x128xf32>
    %186 = arith.addf %181, %185 : vector<16x128xf32>
    %c112_i32_59 = arith.constant 112 : i32
    %187 = tpu.dynamic_rotate %167 by %c112_i32_59 dim 1 : vector<16x128xf32>, i32 -> vector<16x128xf32>
    %188 = vector.extract_strided_slice %55 {offsets = [19, 0], sizes = [1, 128], strides = [1, 1]} : vector<25x128xf32> to vector<1x128xf32>
    %189 = vector.broadcast %188 : vector<1x128xf32> to vector<16x128xf32>
    %190 = arith.mulf %187, %189 : vector<16x128xf32>
    %191 = arith.addf %186, %190 : vector<16x128xf32>
    %c14_i32 = arith.constant 14 : i32
    %192 = tpu.dynamic_rotate %54 by %c14_i32 dim 0 : vector<16x128xf32>, i32 -> vector<16x128xf32>
    %193 = tpu.iota {dimensions = array<i32: 0>} : vector<16x128xi32>
    %c2_i32_60 = arith.constant 2 : i32
    %194 = vector.broadcast %c2_i32_60 : i32 to vector<16x128xi32>
    %195 = arith.addi %193, %194 : vector<16x128xi32>
    %c0_i32_61 = arith.constant 0 : i32
    %196 = vector.broadcast %c0_i32_61 : i32 to vector<16x128xi32>
    %197 = arith.cmpi sge, %195, %196 : vector<16x128xi32>
    %c2_i32_62 = arith.constant 2 : i32
    %198 = vector.broadcast %c2_i32_62 : i32 to vector<16x128xi32>
    %199 = arith.addi %193, %198 : vector<16x128xi32>
    %c16_i32_63 = arith.constant 16 : i32
    %200 = vector.broadcast %c16_i32_63 : i32 to vector<16x128xi32>
    %201 = arith.cmpi slt, %199, %200 : vector<16x128xi32>
    %202 = arith.andi %197, %201 : vector<16x128xi1>
    %cst_64 = arith.constant 0.000000e+00 : f32
    %203 = vector.broadcast %cst_64 : f32 to vector<16x128xf32>
    %204 = arith.select %202, %192, %203 : vector<16x128xi1>, vector<16x128xf32>
    %c16_i32_65 = arith.constant 16 : i32
    %205 = tpu.dynamic_rotate %204 by %c16_i32_65 dim 1 : vector<16x128xf32>, i32 -> vector<16x128xf32>
    %206 = vector.extract_strided_slice %55 {offsets = [20, 0], sizes = [1, 128], strides = [1, 1]} : vector<25x128xf32> to vector<1x128xf32>
    %207 = vector.broadcast %206 : vector<1x128xf32> to vector<16x128xf32>
    %208 = arith.mulf %205, %207 : vector<16x128xf32>
    %209 = arith.addf %191, %208 : vector<16x128xf32>
    %c8_i32_66 = arith.constant 8 : i32
    %210 = tpu.dynamic_rotate %204 by %c8_i32_66 dim 1 : vector<16x128xf32>, i32 -> vector<16x128xf32>
    %211 = vector.extract_strided_slice %55 {offsets = [21, 0], sizes = [1, 128], strides = [1, 1]} : vector<25x128xf32> to vector<1x128xf32>
    %212 = vector.broadcast %211 : vector<1x128xf32> to vector<16x128xf32>
    %213 = arith.mulf %210, %212 : vector<16x128xf32>
    %214 = arith.addf %209, %213 : vector<16x128xf32>
    %215 = vector.extract_strided_slice %55 {offsets = [22, 0], sizes = [1, 128], strides = [1, 1]} : vector<25x128xf32> to vector<1x128xf32>
    %216 = vector.broadcast %215 : vector<1x128xf32> to vector<16x128xf32>
    %217 = arith.mulf %204, %216 : vector<16x128xf32>
    %218 = arith.addf %214, %217 : vector<16x128xf32>
    %c120_i32_67 = arith.constant 120 : i32
    %219 = tpu.dynamic_rotate %204 by %c120_i32_67 dim 1 : vector<16x128xf32>, i32 -> vector<16x128xf32>
    %220 = vector.extract_strided_slice %55 {offsets = [23, 0], sizes = [1, 128], strides = [1, 1]} : vector<25x128xf32> to vector<1x128xf32>
    %221 = vector.broadcast %220 : vector<1x128xf32> to vector<16x128xf32>
    %222 = arith.mulf %219, %221 : vector<16x128xf32>
    %223 = arith.addf %218, %222 : vector<16x128xf32>
    %c112_i32_68 = arith.constant 112 : i32
    %224 = tpu.dynamic_rotate %204 by %c112_i32_68 dim 1 : vector<16x128xf32>, i32 -> vector<16x128xf32>
    %225 = vector.extract_strided_slice %55 {offsets = [24, 0], sizes = [1, 128], strides = [1, 1]} : vector<25x128xf32> to vector<1x128xf32>
    %226 = vector.broadcast %225 : vector<1x128xf32> to vector<16x128xf32>
    %227 = arith.mulf %224, %226 : vector<16x128xf32>
    %228 = arith.addf %223, %227 : vector<16x128xf32>
    %c0_69 = arith.constant 0 : index
    %c0_70 = arith.constant 0 : index
    %229 = vector.load %arg7[%c0_69, %c0_70] : memref<1x128xf32, #tpu.memory_space<vmem>>, vector<1x128xf32>
    %230 = vector.broadcast %229 : vector<1x128xf32> to vector<16x128xf32>
    %231 = arith.addf %228, %230 : vector<16x128xf32>
    %cst_71 = arith.constant 0.000000e+00 : f32
    %232 = vector.broadcast %cst_71 : f32 to vector<16x128xf32>
    %233 = arith.maximumf %231, %232 : vector<16x128xf32>
    %c0_72 = arith.constant 0 : index
    %c0_73 = arith.constant 0 : index
    %234 = vector.load %arg8[%c0_72, %c0_73] : memref<128x128xf32, #tpu.memory_space<vmem>>, vector<128x128xf32>
    %cst_74 = arith.constant dense<0.000000e+00> : vector<16x128xf32>
    %235 = tpu.matmul %233, %234, %cst_74 {dimension_numbers = #tpu.dot_dimension_numbers<[1], [0], [0], [1], [0, 0, 1, 1], [], []>} : vector<16x128xf32>, vector<128x128xf32>, vector<16x128xf32> -> vector<16x128xf32>
    %c0_75 = arith.constant 0 : index
    %c0_76 = arith.constant 0 : index
    %236 = vector.load %arg9[%c0_75, %c0_76] : memref<1x128xf32, #tpu.memory_space<vmem>>, vector<1x128xf32>
    %237 = vector.broadcast %236 : vector<1x128xf32> to vector<16x128xf32>
    %238 = arith.addf %235, %237 : vector<16x128xf32>
    %cst_77 = arith.constant 0.000000e+00 : f32
    %239 = vector.broadcast %cst_77 : f32 to vector<16x128xf32>
    %240 = arith.maximumf %238, %239 : vector<16x128xf32>
    %241 = arith.addf %240, %9 : vector<16x128xf32>
    %c0_78 = arith.constant 0 : index
    %c0_79 = arith.constant 0 : index
    %242 = vector.load %arg10[%c0_78, %c0_79] : memref<128x256xf32, #tpu.memory_space<vmem>>, vector<128x256xf32>
    %cst_80 = arith.constant dense<0.000000e+00> : vector<16x256xf32>
    %243 = tpu.matmul %241, %242, %cst_80 {dimension_numbers = #tpu.dot_dimension_numbers<[1], [0], [0], [1], [0, 0, 1, 1], [], []>} : vector<16x128xf32>, vector<128x256xf32>, vector<16x256xf32> -> vector<16x256xf32>
    %c0_81 = arith.constant 0 : index
    %c0_82 = arith.constant 0 : index
    %244 = vector.load %arg11[%c0_81, %c0_82] : memref<128x256xf32, #tpu.memory_space<vmem>>, vector<128x256xf32>
    %cst_83 = arith.constant dense<0.000000e+00> : vector<16x256xf32>
    %245 = tpu.matmul %10, %244, %cst_83 {dimension_numbers = #tpu.dot_dimension_numbers<[1], [0], [0], [1], [0, 0, 1, 1], [], []>} : vector<16x128xf32>, vector<128x256xf32>, vector<16x256xf32> -> vector<16x256xf32>
    %246 = arith.addf %243, %245 : vector<16x256xf32>
    %c0_84 = arith.constant 0 : index
    %c0_85 = arith.constant 0 : index
    %247 = vector.load %arg12[%c0_84, %c0_85] : memref<1x256xf32, #tpu.memory_space<vmem>>, vector<1x256xf32>
    %248 = vector.broadcast %247 : vector<1x256xf32> to vector<16x256xf32>
    %249 = arith.addf %246, %248 : vector<16x256xf32>
    %cst_86 = arith.constant 0.000000e+00 : f32
    %250 = vector.broadcast %cst_86 : f32 to vector<16x256xf32>
    %251 = arith.maximumf %249, %250 : vector<16x256xf32>
    %c0_87 = arith.constant 0 : index
    %c0_88 = arith.constant 0 : index
    %c0_89 = arith.constant 0 : index
    %252 = vector.load %arg13[%c0_87, %c0_88, %c0_89] : memref<1x16x256xf32, #tpu.memory_space<vmem>>, vector<1x16x256xf32>
    %253 = vector.shape_cast %252 : vector<1x16x256xf32> to vector<16x256xf32>
    %254 = vector.shape_cast %251 : vector<16x256xf32> to vector<1x16x256xf32>
    tpu.vector_store %arg13[%c0_87, %c0_88, %c0_89], %254 {strides = array<i32>} : memref<1x16x256xf32, #tpu.memory_space<vmem>>, vector<1x16x256xf32>,
    return
  }
  func.func @transform_0(%arg0: i32) -> (i32, i32, i32) {
    %c0_i32 = arith.constant 0 : i32
    %c0_i32_0 = arith.constant 0 : i32
    %c0_i32_1 = arith.constant 0 : i32
    return %arg0, %c0_i32, %c0_i32_0 : i32, i32, i32
  }
  func.func @transform_1(%arg0: i32) -> (i32, i32) {
    %c0_i32 = arith.constant 0 : i32
    %c0_i32_0 = arith.constant 0 : i32
    %c0_i32_1 = arith.constant 0 : i32
    return %c0_i32, %c0_i32_0 : i32, i32
  }
  func.func @transform_2(%arg0: i32) -> (i32, i32) {
    %c0_i32 = arith.constant 0 : i32
    %c0_i32_0 = arith.constant 0 : i32
    %c0_i32_1 = arith.constant 0 : i32
    return %c0_i32, %c0_i32_0 : i32, i32
  }
  func.func @transform_3(%arg0: i32) -> (i32, i32, i32) {
    %c0_i32 = arith.constant 0 : i32
    %c0_i32_0 = arith.constant 0 : i32
    %c0_i32_1 = arith.constant 0 : i32
    %c0_i32_2 = arith.constant 0 : i32
    return %c0_i32, %c0_i32_0, %c0_i32_1 : i32, i32, i32
  }
  func.func @transform_4(%arg0: i32) -> (i32, i32) {
    %c0_i32 = arith.constant 0 : i32
    %c0_i32_0 = arith.constant 0 : i32
    %c0_i32_1 = arith.constant 0 : i32
    return %c0_i32, %c0_i32_0 : i32, i32
  }
  func.func @transform_5(%arg0: i32) -> (i32, i32) {
    %c0_i32 = arith.constant 0 : i32
    %c0_i32_0 = arith.constant 0 : i32
    %c0_i32_1 = arith.constant 0 : i32
    return %c0_i32, %c0_i32_0 : i32, i32
  }
  func.func @transform_6(%arg0: i32) -> (i32, i32) {
    %c0_i32 = arith.constant 0 : i32
    %c0_i32_0 = arith.constant 0 : i32
    %c0_i32_1 = arith.constant 0 : i32
    return %c0_i32, %c0_i32_0 : i32, i32
  }
  func.func @transform_7(%arg0: i32) -> (i32, i32) {
    %c0_i32 = arith.constant 0 : i32
    %c0_i32_0 = arith.constant 0 : i32
    %c0_i32_1 = arith.constant 0 : i32
    return %c0_i32, %c0_i32_0 : i32, i32
  }
  func.func @transform_8(%arg0: i32) -> (i32, i32) {
    %c0_i32 = arith.constant 0 : i32
    %c0_i32_0 = arith.constant 0 : i32
    %c0_i32_1 = arith.constant 0 : i32
    return %c0_i32, %c0_i32_0 : i32, i32
  }
  func.func @transform_9(%arg0: i32) -> (i32, i32) {
    %c0_i32 = arith.constant 0 : i32
    %c0_i32_0 = arith.constant 0 : i32
    %c0_i32_1 = arith.constant 0 : i32
    return %c0_i32, %c0_i32_0 : i32, i32
  }
  func.func @transform_10(%arg0: i32) -> (i32, i32) {
    %c0_i32 = arith.constant 0 : i32
    %c0_i32_0 = arith.constant 0 : i32
    %c0_i32_1 = arith.constant 0 : i32
    return %c0_i32, %c0_i32_0 : i32, i32
  }
  func.func @transform_11(%arg0: i32) -> (i32, i32) {
    %c0_i32 = arith.constant 0 : i32
    %c0_i32_0 = arith.constant 0 : i32
    %c0_i32_1 = arith.constant 0 : i32
    return %c0_i32, %c0_i32_0 : i32, i32
  }
  func.func @transform_12(%arg0: i32) -> (i32, i32, i32) {
    %c0_i32 = arith.constant 0 : i32
    %c0_i32_0 = arith.constant 0 : i32
    %c0_i32_1 = arith.constant 0 : i32
    return %arg0, %c0_i32, %c0_i32_0 : i32, i32, i32
  }
}

</mosaic_0001>

<bundles_post_ra>
// kernel: tpu_custom_call.1
= control target key start
LH: loop header
LB: loop body
LE: loop exit
PB: predicated region body
PF: predicated region fallthrough
CT: control target
= control target key end

     0   :  { %s2569_s0 = inlined_call_operand.hbm [shape: f32[2,16,256], index: 0, kind: input, shape index: {}]   ;;  %s2570_s1 = inlined_call_operand.hbm [shape: f32[256,256], index: 1, kind: input, shape index: {}]   ;;  %s2571_s2 = inlined_call_operand.hbm [shape: f32[1,256], index: 2, kind: input, shape index: {}]   ;;  %s2572_s3 = inlined_call_operand.hbm [shape: f32[3,128,128], index: 3, kind: input, shape index: {}]   ;;  %s2573_s4 = inlined_call_operand.vmem [shape: f32[1,128], index: 4, kind: input, shape index: {}]   ;;  %s2574_s5 = inlined_call_operand.hbm [shape: f32[25,128], index: 5, kind: input, shape index: {}]   ;;  %s2575_s6 = inlined_call_operand.vmem [shape: f32[1,128], index: 6, kind: input, shape index: {}]   ;;  %s2576_s7 = inlined_call_operand.hbm [shape: f32[128,128], index: 7, kind: input, shape index: {}]   ;;  %s2577_s8 = inlined_call_operand.vmem [shape: f32[1,128], index: 8, kind: input, shape index: {}]   ;;  %s2578_s9 = inlined_call_operand.hbm [shape: f32[128,256], index: 9, kind: input, shape index: {}]   ;;  %s2579_s10 = inlined_call_operand.hbm [shape: f32[128,256], index: 10, kind: input, shape index: {}]   ;;  %s2580_s11 = inlined_call_operand.vmem [shape: f32[1,256], index: 11, kind: input, shape index: {}]   ;;  %s2581_s12 = inlined_call_operand.hbm [shape: f32[2,16,256], index: 12, kind: output, shape index: {}]  }
   0x1   :  { %2586 = sst [smem:[#allocation23_spill]] %s2570_s1 }
   0x2   :  { %2587 = sst [smem:[#allocation24_spill]] %s2571_s2 }
   0x3   :  { %2588 = sst [smem:[#allocation25_spill]] %s2572_s3 }
   0x4   :  { %2589 = sst [smem:[#allocation26_spill]] %s2574_s5 }
   0x5   :  { %2590 = sst [smem:[#allocation27_spill]] %s2577_s8 }
   0x6   :  { %2591 = sst [smem:[#allocation28_spill]] %s2580_s11 }
   0x7   :  { %2592 = sst [smem:[#allocation29_spill]] %s2581_s12 }
   0x8   :  { %17 = vsyncpa [#allocation3], 0 }
   0x9   :  { %19 = vsyncpa [#allocation3 + $0x1], 0 }
   0xa   :  { %20 = vsyncpa [#allocation6], 0 }
   0xb   :  { %21 = vsyncpa [#allocation9], 0 }
   0xc   :  { %22 = vsyncpa [#allocation12], 0 }
   0xd   :  { %23 = vsyncpa [#allocation15], 0 }
   0xe   :  { %24 = vsyncpa [#allocation4], 0 }
   0xf   :  { %26 = vsyncpa [#allocation4 + $0x1], 0  ;;  %s2083_s21 = smov 0   ;;  %s2085_s22 = smov 0  }
  0x10   :  { %s2087_s23 = smov 0   ;;  %s2089_s24 = smov 0  }
  0x11 LB: > { %s2593_s1 = sld [smem:[#allocation23_spill]]  ;;  %s2107_s28 = sadd.s32 4294967295, %s2000_s24   ;;  %s2000_s24 = sphi %s2089_s24, %s2612_s24   ;;  %s1996_s23 = sphi %s2087_s23, %s2611_s23   ;;  %s1992_s22 = sphi %s2085_s22, %s2610_s22   ;;  %s1988_s21 = sphi %s2083_s21, %s2609_s21  }
  0x12   : > { %p1517_p0 = scmp.ge.s32.totalorder %s2000_s24, 1  ;;  %p53_p1 = scmp.eq.s32.totalorder %s2107_s28, 0 }
  0x13   : > { %p320_p2 = scmp.lt.s32.totalorder %s2000_s24, 3  ;;  %s2002_s30 = smov [#allocation5]  }
  0x14   : > { %s333_s13 = sshll.u32 %s2002_s30, 4  ;;  %s2595_s3 = sld [smem:[#allocation25_spill]]  ;;  %s334_s13 = int_to_ptr.vmem [resolvable:$true] %s333_s13 }
  0x15   : > { %p2112_p3 = pnand %p1517_p0, %p320_p2  ;;  %s2003_s18 = smov [#allocation8]  }
  0x16   : > { %s359_s19 = sshll.u32 %s2003_s18, 4  ;;  %s2583_s20 = smov 256   ;;  %s360_s19 = int_to_ptr.vmem [resolvable:$true] %s359_s19 }
  0x17   : > { %s331_s27 = sshll.u32 %s2593_s1, 4  ;;  %p1580_p4 = pneg %p2112_p3  ;;  %s332_s27 = int_to_ptr.hbm [resolvable:$true] %s331_s27 }
  0x18   : > { %s2585_s25 = smov 16   ;;  %s2006_s26 = smov 128  }
  0x19   : > { %p2124_p6 = pnand %p1580_p4, %p53_p1  ;;  %s2007_s30 = smov 8  }
  0x1a   : > { %s357_s16 = sshll.u32 %s2595_s3, 4  ;;  %s391_s1 = sshll.u32 %s2576_s7, 4  ;;  %s358_s16 = int_to_ptr.hbm [resolvable:$true] %s357_s16  ;;  %s392_s1 = int_to_ptr.hbm [resolvable:$true] %s391_s1 }
  0x1b   : > { %1583 = dma.hbm_to_vmem [thread:$0]  (!%p2124_p6), %s332_s27, 8192, %s334_s13, [#allocation6], %s2583_s20, %s2583_s20, %s2585_s25  }
  0x1c   : > { %1589 = dma.hbm_to_vmem [thread:$0]  (!%p2124_p6), %s358_s16, 6144, %s360_s19, [#allocation9], %s2006_s26, %s2006_s26, %s2007_s30  }
  0x1d   : > { %s2008_s3 = smov [#allocation11]   ;;  %s2597_s2 = sld [smem:[#allocation24_spill]] }
  0x1e   : > { %s393_s18 = sshll.u32 %s2008_s3, 4  ;;  %s2009_s27 = smov [#allocation7]   ;;  %s394_s18 = int_to_ptr.vmem [resolvable:$true] %s393_s18 }
  0x1f   : > { %1595 = dma.hbm_to_vmem [thread:$0]  (!%p2124_p6), %s392_s1, 2048, %s394_s18, [#allocation12], %s2006_s26, %s2006_s26, %s2007_s30  }
  0x20   : > { %s348_s13 = sshll.u32 %s2009_s27, 4  ;;  %s2598_s5 = sld [smem:[#allocation26_spill]]  ;;  %s349_s13 = int_to_ptr.vmem [resolvable:$true] %s348_s13 }
  0x21   : > { %s408_s11 = sshll.u32 %s2578_s9, 4  ;;  %s2010_s12 = smov [#allocation10]   ;;  %s409_s11 = int_to_ptr.hbm [resolvable:$true] %s408_s11 }
  0x22   : > { %s376_s1 = sshll.u32 %s2010_s12, 4  ;;  %s2011_s20 = smov [#allocation13]   ;;  %s377_s1 = int_to_ptr.vmem [resolvable:$true] %s376_s1 }
  0x23   : > { %s346_s8 = sshll.u32 %s2597_s2, 4  ;;  %s422_s27 = sshll.u32 %s2579_s10, 4  ;;  %s347_s8 = int_to_ptr.hbm [resolvable:$true] %s346_s8  ;;  %s423_s27 = int_to_ptr.hbm [resolvable:$true] %s422_s27 }
  0x24   : > { %1586 = dma.hbm_to_vmem [thread:$0]  (!%p2124_p6), %s347_s8, 32, %s349_s13, [#allocation6]  }
  0x25   : > { %s410_s8 = sshll.u32 %s2011_s20, 4  ;;  %s2599_s13 = smov 256   ;;  %s411_s8 = int_to_ptr.vmem [resolvable:$true] %s410_s8 }
  0x26   : > { %s374_s19 = sshll.u32 %s2598_s5, 4  ;;  %s1516_s16 = sadd.s32 4294967294, %s2000_s24   ;;  %s375_s19 = int_to_ptr.hbm [resolvable:$true] %s374_s19 }
  0x27   : > { %1592 = dma.hbm_to_vmem [thread:$0]  (!%p2124_p6), %s375_s19, 512, %s377_s1, [#allocation9], %s2006_s26, %s2006_s26, %s2007_s30  }
  0x28   : > { %1598 = dma.hbm_to_vmem [thread:$0]  (!%p2124_p6), %s409_s11, 4096, %s411_s8, [#allocation12], %s2599_s13, %s2599_s13, %s2585_s25  }
  0x29   : > { %s2012_s26 = smov [#allocation14]   ;;  %s2168_s19 = sadd.s32 1, %s2000_s24  }
  0x2a   : > { %s424_s30 = sshll.u32 %s2012_s26, 4  ;;  %s39_s3 = sadd.s32 1, %s1996_s23  ;;  %s425_s30 = int_to_ptr.vmem [resolvable:$true] %s424_s30 }
  0x2b   : > { %1601 = dma.hbm_to_vmem [thread:$0]  (!%p2124_p6), %s423_s27, 4096, %s425_s30, [#allocation15], %s2599_s13, %s2599_s13, %s2585_s25  }
  0x2c   : > { %s36_s14 = ssub.s32 %s2000_s24, %s2168_s19  ;;  %p46_p7 = scmp.ne.s32.totalorder %s1996_s23, %s1992_s22 }
  0x2d   : > { %p37_p8 = scmp.eq.s32.totalorder %s36_s14, 0  ;;  %p47_p9 = scmp.eq.s32.totalorder %s2000_s24, 0 }
  0x2e   : > { %p52_p10 = scmp.ne.s32.totalorder %s1992_s22, %s1988_s21  ;;  %p307_p11 = scmp.eq.s32.totalorder %s2107_s28, 1 }
  0x2f   : > { %s2180_s11 = scalar_select %p37_p8, %s1996_s23, %s39_s3  }
  0x30   : > { %p2184_p12 = por %p53_p1, %p52_p10  ;;  %p2188_p13 = por %p307_p11, %p46_p7 }
  0x31   : > { %p313_p0 = scmp.eq.s32.totalorder %s1516_s16, 1  ;;  %p48_p2 = por %p47_p9, %p46_p7 }
  0x32   : > { %s441_s1 = sand.u32 1, %s1996_s23   ;;  %p1617_p6 = scmp.lt.s32.totalorder %s2000_s24, 2 }
  0x33   : > { %p2193_p4 = por %p313_p0, %p52_p10  ;;  %s1526_s8 = sshll.u32 %s441_s1, 5 }
  0x34   : > { %s1546_s15 = sshll.u32 %s2000_s24, 5  ;;  %s445_s3 = scalar_lea.vmem [#allocation2], %s1526_s8 }
  0x35   : > { %s450_s26 = scalar_lea.hbm %s2569_s0, %s1546_s15  ;;  %s453_s14 = sshll.u32 %s445_s3, 4  ;;  %s454_s14 = int_to_ptr.vmem [resolvable:$true] %s453_s14 }
  0x36   : > { %s451_s30 = sshll.u32 %s450_s26, 4  ;;  %p2202_p8 = pnand %p1617_p6, %p48_p2  ;;  %s452_s30 = int_to_ptr.hbm [resolvable:$true] %s451_s30 }
  0x37   : > { %s442_s25 = scalar_lea.sflag [#allocation3], %s441_s1  ;;  %s1888_s2 = sshra.s32 %s452_s30, 4  ;;  %s1889_s2 = int_to_ptr.hbm [resolvable:$true] %s1888_s2 }
  0x38   : > { %s1890_s5 = scalar_lea.hbm %s1889_s2, 32  ;;  %p1892_p9 = pneg %p2202_p8 }
  0x39   : > { %p1891_p7 = scmp.ne.s32.totalorder %s1889_s2, %s1890_s5  ;;  %s1895_s8 = scalar_lea.hbm %s2569_s0, 64 }
  0x3a   : > { %p1896_p0 = scmp.lt.s32.totalorder %s1889_s2, %s2569_s0  ;;  %p1897_p2 = scmp.lt.s32.totalorder %s1895_s8, %s1890_s5 }
  0x3b   : > { %p1893_p10 = pnand %p1892_p9, %p1891_p7 }
  0x3c   : > { %p1898_p6 = por %p1897_p2, %p1896_p0 }
  0x3d   : > { %p1894_p11 = pneg %p1893_p10 }
  0x3f   : > { %p1899_p5 = pnand %p1898_p6, %p1894_p11 }
  0x41   : > { %1902 = shalt.err (!%p1899_p5)
}
  0x42   : > { %s2604_s1 = smov 16   ;;  %465 = sbr.rel (%p2112_p3) target bundleno = 908 (0x38c), region = 68 }
  0x43   : > { %1605 = dma.hbm_to_vmem [thread:$0]  (!%p2202_p8), %s452_s30, 512, %s454_s14, %s442_s25, %s2599_s13, %s2599_s13, %s2604_s1  }
  0x44   : > { %s2222_s3 = sand.u32 (!%p2112_p3), 1, %s1992_s22  }
  0x45   : > { %s1530_s2 = sshll.u32 (!%p2112_p3), %s2222_s3, 5  ;;  %s468_s5 = scalar_lea.sflag (!%p2112_p3), [#allocation3], %s2222_s3 }
  0x46   : > { %s2228_s15 = scalar_lea.vmem (!%p2112_p3), [#allocation2], %s1530_s2 }
  0x47   : > { %1963 = dma.done.wait (%p2184_p12), %s468_s5, 512  }
  0x48   : > { %1965 = vsyncadd (%p2184_p12), %s468_s5, 4294966784 }
  0x49   : > { %1967 = dma.done.wait (%p53_p1), [#allocation6], 8224  }
  0x4a   : > { %1969 = vsyncadd (%p53_p1), [#allocation6], 4294959072 }
  0x4b   : > { %1971 = dma.done.wait (%p53_p1), [#allocation9], 6656  }
  0x4c   : > { %1973 = vsyncadd (%p53_p1), [#allocation9], 4294960640 }
  0x4d   : > { %1975 = dma.done.wait (%p53_p1), [#allocation12], 6144  }
  0x4e   : > { %1977 = vsyncadd (%p53_p1), [#allocation12], 4294961152 }
  0x4f   : > { %1979 = dma.done.wait (%p53_p1), [#allocation15], 4096  }
  0x50   : > { %1981 = vsyncadd (%p53_p1), [#allocation15], 4294963200  ;;  %v582_v0 = vld [vmem:[#allocation5 + $0xf0] sm:$0xff]  ;;  %v580_v1 = vld [vmem:[#allocation5 + $0xe0] sm:$0xff]  ;;  %s2013_s13 = smov 8   ;;  %s2014_s17 = smov 16  }
  0x51   : > { %v614_v2 = vld [vmem:[#allocation5 + $0x1f0] sm:$0xff]  ;;  %622 = vmatpush.msra.mxu0 %v582_v0  ;;  %v612_v3 = vld [vmem:[#allocation5 + $0x1e0] sm:$0xff]  ;;  %v583_v16 = vld [vmem:[#allocation5 + $0xf8] sm:$0xff]  ;;  %s2015_s30 = smov 120   ;;  %s2016_s14 = smov 112  }
  0x52   : > { %645 = vmatpush.msra.mxu1 %v614_v2  ;;  %v578_v4 = vld [vmem:[#allocation5 + $0xd0] sm:$0xff]  ;;  %v576_v6 = vld [vmem:[#allocation5 + $0xc0] sm:$0xff]  ;;  %v581_v17 = vld [vmem:[#allocation5 + $0xe8] sm:$0xff]  ;;  %668 = vmatpush.msra.mxu2 %v583_v16  ;;  %s2605_s26 = sld [smem:[#allocation27_spill]]  ;;  %s547_s29 = scalar_lea.vmem [#allocation16], %s1530_s2 }
  0x53   : > { %v610_v5 = vld [vmem:[#allocation5 + $0x1d0] sm:$0xff]  ;;  %623 = vmatpush.msra.mxu0 %v580_v1  ;;  %v608_v7 = vld [vmem:[#allocation5 + $0x1c0] sm:$0xff]  ;;  %v579_v20 = vld [vmem:[#allocation5 + $0xd8] sm:$0xff]  ;;  %s1547_s25 = sshll.u32 %s2107_s28, 5  ;;  %s1373_s18 = sshll.u32 %s547_s29, 4  ;;  %s1374_s18 = int_to_ptr.vmem [resolvable:$true] %s1373_s18 }
  0x54   : > { %646 = vmatpush.msra.mxu1 %v612_v3  ;;  %v574_v8 = vld [vmem:[#allocation5 + $0xb0] sm:$0xff]  ;;  %v572_v10 = vld [vmem:[#allocation5 + $0xa0] sm:$0xff]  ;;  %v615_v21 = vld [vmem:[#allocation5 + $0x1f8] sm:$0xff]  ;;  %669 = vmatpush.msra.mxu2 %v581_v17  ;;  %s1361_s28 = scalar_lea.sflag [#allocation4], %s2222_s3 }
  0x55   : > { %624 = vmatpush.msra.mxu0 %v578_v4  ;;  %v606_v9 = vld [vmem:[#allocation5 + $0x1b0] sm:$0xff]  ;;  %v604_v11 = vld [vmem:[#allocation5 + $0x1a0] sm:$0xff]  ;;  %v613_v22 = vld [vmem:[#allocation5 + $0x1e8] sm:$0xff]  ;;  %691 = vmatpush.msra.mxu3 %v615_v21 }
  0x56   : > { %647 = vmatpush.msra.mxu1 %v610_v5  ;;  %v570_v12 = vld [vmem:[#allocation5 + $0x90] sm:$0xff]  ;;  %v568_v14 = vld [vmem:[#allocation5 + $0x80] sm:$0xff]  ;;  %v577_v25 = vld [vmem:[#allocation5 + $0xc8] sm:$0xff]  ;;  %670 = vmatpush.msra.mxu2 %v579_v20 }
  0x57   : > { %625 = vmatpush.msra.mxu0 %v576_v6  ;;  %v602_v13 = vld [vmem:[#allocation5 + $0x190] sm:$0xff]  ;;  %v600_v15 = vld [vmem:[#allocation5 + $0x180] sm:$0xff]  ;;  %v611_v26 = vld [vmem:[#allocation5 + $0x1d8] sm:$0xff]  ;;  %692 = vmatpush.msra.mxu3 %v613_v22 }
  0x58   : > { %648 = vmatpush.msra.mxu1 %v608_v7  ;;  %v566_v18 = vld [vmem:[#allocation5 + $0x70] sm:$0xff]  ;;  %v564_v23 = vld [vmem:[#allocation5 + $0x60] sm:$0xff]  ;;  %v575_v29 = vld [vmem:[#allocation5 + $0xb8] sm:$0xff]  ;;  %671 = vmatpush.msra.mxu2 %v577_v25 }
  0x59   : > { %626 = vmatpush.msra.mxu0 %v574_v8  ;;  %v598_v19 = vld [vmem:[#allocation5 + $0x170] sm:$0xff]  ;;  %v596_v24 = vld [vmem:[#allocation5 + $0x160] sm:$0xff]  ;;  %v609_v30 = vld [vmem:[#allocation5 + $0x1c8] sm:$0xff]  ;;  %693 = vmatpush.msra.mxu3 %v611_v26 }
  0x5a   : > { %649 = vmatpush.msra.mxu1 %v606_v9  ;;  %v562_v27 = vld [vmem:[#allocation5 + $0x50] sm:$0xff]  ;;  %v560_v31 = vld [vmem:[#allocation5 + $0x40] sm:$0xff]  ;;  %v573_v33 = vld [vmem:[#allocation5 + $0xa8] sm:$0xff]  ;;  %672 = vmatpush.msra.mxu2 %v575_v29 }
  0x5b   : > { %627 = vmatpush.msra.mxu0 %v572_v10  ;;  %v594_v28 = vld [vmem:[#allocation5 + $0x150] sm:$0xff]  ;;  %v592_v32 = vld [vmem:[#allocation5 + $0x140] sm:$0xff]  ;;  %v607_v34 = vld [vmem:[#allocation5 + $0x1b8] sm:$0xff]  ;;  %694 = vmatpush.msra.mxu3 %v609_v30 }
  0x5c   : > { %650 = vmatpush.msra.mxu1 %v604_v11  ;;  %v558_v35 = vld [vmem:[#allocation5 + $0x30] sm:$0xff]  ;;  %v571_v37 = vld [vmem:[#allocation5 + $0x98] sm:$0xff]  ;;  %v605_v38 = vld [vmem:[#allocation5 + $0x1a8] sm:$0xff]  ;;  %673 = vmatpush.msra.mxu2 %v573_v33 }
  0x5d   : > { %628 = vmatpush.msra.mxu0 %v570_v12  ;;  %v590_v36 = vld [vmem:[#allocation5 + $0x130] sm:$0xff]  ;;  %v556_v39 = vld [vmem:[#allocation5 + $0x20] sm:$0xff]  ;;  %695 = vmatpush.msra.mxu3 %v607_v34  ;;  %v569_v41 = vld [vmem:[#allocation5 + $0x88] sm:$0xff] }
  0x5e   : > { %651 = vmatpush.msra.mxu1 %v602_v13  ;;  %v588_v40 = vld [vmem:[#allocation5 + $0x120] sm:$0xff]  ;;  %v603_v42 = vld [vmem:[#allocation5 + $0x198] sm:$0xff]  ;;  %v554_v43 = vld [vmem:[#allocation5 + $0x10] sm:$0xff]  ;;  %674 = vmatpush.msra.mxu2 %v571_v37 }
  0x5f   : > { %629 = vmatpush.msra.mxu0 %v568_v14  ;;  %v586_v44 = vld [vmem:[#allocation5 + $0x110] sm:$0xff]  ;;  %696 = vmatpush.msra.mxu3 %v605_v38  ;;  %v567_v45 = vld [vmem:[#allocation5 + $0x78] sm:$0xff]  ;;  %v601_v46 = vld [vmem:[#allocation5 + $0x188] sm:$0xff] }
  0x60   : > { %652 = vmatpush.msra.mxu1 %v600_v15  ;;  %v552_v47 = vld [vmem:[#allocation5] sm:$0xff]  ;;  %675 = vmatpush.msra.mxu2 %v569_v41  ;;  %v2254_v50 = vld [vmem:[%s2228_s15 + $0x8] sm:$0xff]  ;;  %v563_v52 = vld [vmem:[#allocation5 + $0x58] sm:$0xff] }
  0x61   : > { %630 = vmatpush.msra.mxu0 %v566_v18  ;;  %v584_v48 = vld [vmem:[#allocation5 + $0x100] sm:$0xff]  ;;  %697 = vmatpush.msra.mxu3 %v603_v42  ;;  %v565_v51 = vld [vmem:[#allocation5 + $0x68] sm:$0xff]  ;;  %v599_v55 = vld [vmem:[#allocation5 + $0x178] sm:$0xff] }
  0x62   : > { %653 = vmatpush.msra.mxu1 %v598_v19  ;;  %v2251_v49 = vld [vmem:[%s2228_s15] sm:$0xff]  ;;  %676 = vmatpush.msra.mxu2 %v567_v45  ;;  %v767_v56 = vld [vmem:[#allocation8 + $0xf0] sm:$0xff]  ;;  %v597_v58 = vld [vmem:[#allocation5 + $0x168] sm:$0xff] }
  0x63   : > { %631 = vmatpush.msra.mxu0 %v564_v23  ;;  %v768_v53 = vld [vmem:[#allocation8 + $0xf8] sm:$0xff]  ;;  %698 = vmatpush.msra.mxu3 %v601_v46  ;;  %v750_v57 = vld [vmem:[#allocation8 + $0x70] sm:$0xff]  ;;  %v561_v59 = vld [vmem:[#allocation5 + $0x48] sm:$0xff] }
  0x64   : > { %654 = vmatpush.msra.mxu1 %v596_v24  ;;  %v751_v54 = vld [vmem:[#allocation8 + $0x78] sm:$0xff]  ;;  %677 = vmatpush.msra.mxu2 %v565_v51  ;;  %v766_v60 = vld [vmem:[#allocation8 + $0xe8] sm:$0xff]  ;;  %v765_v0 = vld [vmem:[#allocation8 + $0xe0] sm:$0xff] }
  0x65   : > { %632 = vmatpush.msra.mxu0 %v562_v27  ;;  %699 = vmatpush.msra.mxu3 %v599_v55  ;;  %v749_v61 = vld [vmem:[#allocation8 + $0x68] sm:$0xff]  ;;  %v595_v62 = vld [vmem:[#allocation5 + $0x158] sm:$0xff]  ;;  %v748_v5 = vld [vmem:[#allocation8 + $0x60] sm:$0xff] }
  0x66   : > { %655 = vmatpush.msra.mxu1 %v594_v28  ;;  %678 = vmatpush.msra.mxu2 %v563_v52  ;;  %v559_v63 = vld [vmem:[#allocation5 + $0x38] sm:$0xff]  ;;  %v550_v1 = vld [vmem:[%s2228_s15 + $0x10] sm:$0xff]  ;;  %v557_v3 = vld [vmem:[#allocation5 + $0x28] sm:$0xff] }
  0x67   : > { %633 = vmatpush.msra.mxu0 %v560_v31  ;;  %700 = vmatpush.msra.mxu3 %v597_v58  ;;  %v2260_v2 = vld [vmem:[%s2228_s15 + $0x18] sm:$0xff]  ;;  %v593_v6 = vld [vmem:[#allocation5 + $0x148] sm:$0xff]  ;;  %v2266_v52 = vld [vmem:[#allocation7] sm:$0x3]  ;;  %s2606_s15 = sld [smem:[#allocation28_spill]] }
  0x68   : > { %656 = vmatpush.msra.mxu1 %v592_v32  ;;  %679 = vmatpush.msra.mxu2 %v561_v59  ;;  %v764_v4 = vld [vmem:[#allocation8 + $0xd8] sm:$0xff]  ;;  %v763_v8 = vld [vmem:[#allocation8 + $0xd0] sm:$0xff]  ;;  %v553_v11 = vld [vmem:[#allocation5 + $0x8] sm:$0xff]  ;;  %v618_v59 = vperm.slane %v2266_v52, 0 }
  0x69   : > { %634 = vmatpush.msra.mxu0 %v558_v35  ;;  %701 = vmatpush.msra.mxu3 %v595_v62  ;;  %v555_v7 = vld [vmem:[#allocation5 + $0x18] sm:$0xff]  ;;  %v762_v12 = vld [vmem:[#allocation8 + $0xc8] sm:$0xff]  ;;  %v761_v15 = vld [vmem:[#allocation8 + $0xc0] sm:$0xff] }
  0x6a   : > { %657 = vmatpush.msra.mxu1 %v590_v36  ;;  %680 = vmatpush.msra.mxu2 %v559_v63  ;;  %v747_v9 = vld [vmem:[#allocation8 + $0x58] sm:$0xff]  ;;  %v746_v14 = vld [vmem:[#allocation8 + $0x50] sm:$0xff]  ;;  %v589_v16 = vld [vmem:[#allocation5 + $0x128] sm:$0xff] }
  0x6b   : > { %635 = vmatpush.msra.mxu0 %v556_v39  ;;  %v591_v10 = vld [vmem:[#allocation5 + $0x138] sm:$0xff]  ;;  %702 = vmatpush.msra.mxu3 %v593_v6  ;;  %v745_v18 = vld [vmem:[#allocation8 + $0x48] sm:$0xff]  ;;  %v843_v22 = vld [vmem:[#allocation8 + $0x160] sm:$0xff] }
  0x6c   : > { %658 = vmatpush.msra.mxu1 %v588_v40  ;;  %681 = vmatpush.msra.mxu2 %v557_v3  ;;  %v846_v13 = vld [vmem:[#allocation8 + $0x178] sm:$0xff]  ;;  %v845_v17 = vld [vmem:[#allocation8 + $0x170] sm:$0xff]  ;;  %v844_v20 = vld [vmem:[#allocation8 + $0x168] sm:$0xff]  ;;  %v720_v3 = vlaneseq }
  0x6d   : > { %636 = vmatpush.msra.mxu0 %v554_v43  ;;  %703 = vmatpush.msra.mxu3 %v591_v10  ;;  %v760_v19 = vld [vmem:[#allocation8 + $0xb8] sm:$0xff]  ;;  %v759_v21 = vld [vmem:[#allocation8 + $0xb0] sm:$0xff]  ;;  %v758_v23 = vld [vmem:[#allocation8 + $0xa8] sm:$0xff] }
  0x6e   : > { %659 = vmatpush.msra.mxu1 %v586_v44  ;;  %682 = vmatpush.msra.mxu2 %v555_v7  ;;  %v842_v24 = vld [vmem:[#allocation8 + $0x158] sm:$0xff]  ;;  %v757_v25 = vld [vmem:[#allocation8 + $0xa0] sm:$0xff]  ;;  %v841_v26 = vld [vmem:[#allocation8 + $0x150] sm:$0xff]  ;;  %v2271_v10 = vshrl.u32 %v720_v3, 7 }
  0x6f   : > { %637 = vmatpush.msra.mxu0 %v552_v47  ;;  %704 = vmatpush.msra.mxu3 %v589_v16  ;;  %v840_v27 = vld [vmem:[#allocation8 + $0x148] sm:$0xff]  ;;  %v756_v28 = vld [vmem:[#allocation8 + $0x98] sm:$0xff]  ;;  %v744_v30 = vld [vmem:[#allocation8 + $0x40] sm:$0xff] }
  0x70   : > { %660 = vmatpush.msra.mxu1 %v584_v48  ;;  %638 = vmatmul.f32.vlgmr.msra.gmra.mxu0 %v2251_v49  ;;  %v587_v29 = vld [vmem:[#allocation5 + $0x118] sm:$0xff]  ;;  %v839_v31 = vld [vmem:[#allocation8 + $0x140] sm:$0xff]  ;;  %v754_v36 = vld [vmem:[#allocation8 + $0x88] sm:$0xff]  ;;  %vm722_vm0 = vcmp.lt.s32.totalorder %v2271_v10, 1  ;;  %vm817_vm2 = vcmp.lt.s32.totalorder %v2271_v10, 7  ;;  %vm1077_vm4 = vcmp.lt.s32.totalorder %v2271_v10, 6 }
  0x71   : > { %661 = vmatmul.f32.vlgmr.msra.gmra.mxu1 %v2254_v50  ;;  %769 = vmatpush.msrb.mxu0 %v768_v53  ;;  %v755_v32 = vld [vmem:[#allocation8 + $0x90] sm:$0xff]  ;;  %v585_v33 = vld [vmem:[#allocation5 + $0x108] sm:$0xff]  ;;  %v743_v34 = vld [vmem:[#allocation8 + $0x38] sm:$0xff]  ;;  %vm886_vm6 = vcmp.lt.s32.totalorder %v2271_v10, 2 }
  0x72   : > { %792 = vmatpush.msrb.mxu1 %v751_v54  ;;  %683 = vmatpush.msra.mxu2 %v553_v11  ;;  %v838_v35 = vld [vmem:[#allocation8 + $0x138] sm:$0xff]  ;;  %v742_v37 = vld [vmem:[#allocation8 + $0x30] sm:$0xff]  ;;  %v753_v39 = vld [vmem:[#allocation8 + $0x80] sm:$0xff] }
  0x73   : > { %770 = vmatpush.msrb.mxu0 %v767_v56  ;;  %684 = vmatmul.f32.vlgmr.msra.gmra.mxu2 %v2251_v49  ;;  %v837_v38 = vld [vmem:[#allocation8 + $0x130] sm:$0xff]  ;;  %v741_v40 = vld [vmem:[#allocation8 + $0x28] sm:$0xff]  ;;  %v740_v42 = vld [vmem:[#allocation8 + $0x20] sm:$0xff] }
  0x74   : > { %793 = vmatpush.msrb.mxu1 %v750_v57  ;;  %847 = vmatpush.msrb.mxu2 %v846_v13  ;;  %v836_v41 = vld [vmem:[#allocation8 + $0x128] sm:$0xff]  ;;  %v835_v43 = vld [vmem:[#allocation8 + $0x120] sm:$0xff]  ;;  %v739_v44 = vld [vmem:[#allocation8 + $0x18] sm:$0xff] }
  0x75   : > { %771 = vmatpush.msrb.mxu0 %v766_v60  ;;  %705 = vmatpush.msra.mxu3 %v587_v29  ;;  %v834_v45 = vld [vmem:[#allocation8 + $0x118] sm:$0xff]  ;;  %v738_v46 = vld [vmem:[#allocation8 + $0x10] sm:$0xff]  ;;  %v737_v48 = vld [vmem:[#allocation8 + $0x8] sm:$0xff] }
  0x76   : > { %794 = vmatpush.msrb.mxu1 %v749_v61  ;;  %848 = vmatpush.msrb.mxu2 %v845_v17  ;;  %v833_v47 = vld [vmem:[#allocation8 + $0x110] sm:$0xff]  ;;  %v832_v49 = vld [vmem:[#allocation8 + $0x108] sm:$0xff]  ;;  %v831_v51 = vld [vmem:[#allocation8 + $0x100] sm:$0xff] }
  0x77   : > { %772 = vmatpush.msrb.mxu0 %v765_v0  ;;  %706 = vmatpush.msra.mxu3 %v585_v33  ;;  %v1248_v53 = vld [vmem:[#allocation14 + $0xf0] sm:$0xff]  ;;  %v1249_v54 = vld [vmem:[#allocation14 + $0xf8] sm:$0xff]  ;;  %v1246_v55 = vld [vmem:[#allocation14 + $0xe0] sm:$0xff] }
  0x78   : > { %641 = vmatmul.f32.gmra.mxu0 %v550_v1  ;;  %795 = vmatpush.msrb.mxu1 %v748_v5  ;;  %v1247_v56 = vld [vmem:[#allocation14 + $0xe8] sm:$0xff]  ;;  %v1244_v57 = vld [vmem:[#allocation14 + $0xd0] sm:$0xff]  ;;  %v1245_v58 = vld [vmem:[#allocation14 + $0xd8] sm:$0xff] }
  0x79   : > { %664 = vmatmul.f32.gmra.mxu1 %v2260_v2  ;;  %773 = vmatpush.msrb.mxu0 %v764_v4  ;;  %v1242_v60 = vld [vmem:[#allocation14 + $0xc0] sm:$0xff]  ;;  %v1243_v61 = vld [vmem:[#allocation14 + $0xc8] sm:$0xff]  ;;  %v1240_v0 = vld [vmem:[#allocation14 + $0xb0] sm:$0xff] }
  0x7a   : > { %796 = vmatpush.msrb.mxu1 %v747_v9  ;;  %849 = vmatpush.msrb.mxu2 %v844_v20  ;;  %v1238_v4 = vld [vmem:[#allocation14 + $0xa0] sm:$0xff]  ;;  %v1239_v5 = vld [vmem:[#allocation14 + $0xa8] sm:$0xff]  ;;  %v1237_v7 = vld [vmem:[#allocation14 + $0x98] sm:$0xff] }
  0x7b   : > { %774 = vmatpush.msrb.mxu0 %v763_v8  ;;  %687 = vmatmul.f32.gmra.mxu2 %v550_v1  ;;  %v1241_v1 = vld [vmem:[#allocation14 + $0xb8] sm:$0xff]  ;;  %v1236_v9 = vld [vmem:[#allocation14 + $0x90] sm:$0xff]  ;;  %v1235_v11 = vld [vmem:[#allocation14 + $0x88] sm:$0xff] }
  0x7c   : > { %797 = vmatpush.msrb.mxu1 %v746_v14  ;;  %850 = vmatpush.msrb.mxu2 %v843_v22  ;;  %v1232_v17 = vld [vmem:[#allocation14 + $0x70] sm:$0xff]  ;;  %v1229_v22 = vld [vmem:[#allocation14 + $0x58] sm:$0xff] }
  0x7d   : > { %775 = vmatpush.msrb.mxu0 %v762_v12  ;;  %707 = vmatmul.f32.vlgmr.msra.gmra.mxu3 %v2254_v50  ;;  %v736_v50 = vld [vmem:[#allocation8] sm:$0xff] }
  0x7e   : > { %798 = vmatpush.msrb.mxu1 %v745_v18  ;;  %851 = vmatpush.msrb.mxu2 %v842_v24  ;;  %v1234_v12 = vld [vmem:[#allocation14 + $0x80] sm:$0xff]  ;;  %v2275_v18 = vadd.s32 4294967295, %v2271_v10  ;;  %v1228_v24 = vld [vmem:[#allocation14 + $0x50] sm:$0xff] }
  0x7f   : > { %776 = vmatpush.msrb.mxu0 %v761_v15  ;;  %v1233_v15 = vld [vmem:[#allocation14 + $0x78] sm:$0xff] }
  0x80   : > { %852 = vmatpush.msrb.mxu2 %v841_v26  ;;  %799 = vmatpush.msrb.mxu1 %v744_v30  ;;  %vm728_vm1 = vcmp.ge.s32.totalorder %v2275_v18, 0  ;;  %v1227_v26 = vld [vmem:[#allocation14 + $0x48] sm:$0xff] }
  0x81   : > { %777 = vmatpush.msrb.mxu0 %v760_v19  ;;  %v1231_v19 = vld [vmem:[#allocation14 + $0x68] sm:$0xff] }
  0x82   : > { %853 = vmatpush.msrb.mxu2 %v840_v27  ;;  %800 = vmatpush.msrb.mxu1 %v743_v34 }
  0x83   : > { %778 = vmatpush.msrb.mxu0 %v759_v21  ;;  %v1230_v21 = vld [vmem:[#allocation14 + $0x60] sm:$0xff] }
  0x84   : > { %854 = vmatpush.msrb.mxu2 %v839_v31  ;;  %801 = vmatpush.msrb.mxu1 %v742_v37  ;;  %v1226_v31 = vld [vmem:[#allocation14 + $0x40] sm:$0xff]  ;;  %v619_v37 = vperm.slane %v2266_v52, 1 }
  0x85   : > { %779 = vmatpush.msrb.mxu0 %v758_v23  ;;  %710 = vmatmul.f32.gmra.mxu3 %v2260_v2 }
  0x86   : > { %855 = vmatpush.msrb.mxu2 %v838_v35  ;;  %802 = vmatpush.msrb.mxu1 %v741_v40  ;;  %v1225_v40 = vld [vmem:[#allocation14 + $0x38] sm:$0xff] }
  0x87   : > { %780 = vmatpush.msrb.mxu0 %v757_v25  ;;  %v2283_v25 = vadd.s32 8, %v2271_v10 }
  0x88   : > { %856 = vmatpush.msrb.mxu2 %v837_v38  ;;  %803 = vmatpush.msrb.mxu1 %v740_v42  ;;  %v1223_v42 = vld [vmem:[#allocation14 + $0x28] sm:$0xff] }
  0x89   : > { %781 = vmatpush.msrb.mxu0 %v756_v28  ;;  %v2297_v34 = vadd.s32 1, %v2283_v25 }
  0x8a   : > { %857 = vmatpush.msrb.mxu2 %v836_v41  ;;  %804 = vmatpush.msrb.mxu1 %v739_v44  ;;  %v1222_v41 = vld [vmem:[#allocation14 + $0x20] sm:$0xff]  ;;  %v1220_v44 = vld [vmem:[#allocation14 + $0x10] sm:$0xff] }
  0x8b   : > { %782 = vmatpush.msrb.mxu0 %v755_v32  ;;  %vm825_vm3 = vcmp.lt.s32.totalorder %v2297_v34, 16 }
  0x8c   : > { %858 = vmatpush.msrb.mxu2 %v835_v43  ;;  %805 = vmatpush.msrb.mxu1 %v738_v46 }
  0x8d   : > { %783 = vmatpush.msrb.mxu0 %v754_v36 }
  0x8e   : > { %859 = vmatpush.msrb.mxu2 %v834_v45  ;;  %806 = vmatpush.msrb.mxu1 %v737_v48  ;;  %v1221_v45 = vld [vmem:[#allocation14 + $0x18] sm:$0xff]  ;;  %v1218_v48 = vld [vmem:[#allocation14] sm:$0xff] }
  0x8f   : > { %784 = vmatpush.msrb.mxu0 %v753_v39  ;;  %v1224_v39 = vld [vmem:[#allocation14 + $0x30] sm:$0xff] }
  0x90   : > { %860 = vmatpush.msrb.mxu2 %v833_v47  ;;  %807 = vmatpush.msrb.mxu1 %v736_v50 }
  0x91   : > { %1250 = vmatpush.msra.mxu0 %v1248_v53 }
  0x92   : > { %861 = vmatpush.msrb.mxu2 %v832_v49  ;;  %1273 = vmatpush.msra.mxu1 %v1249_v54  ;;  %v1219_v49 = vld [vmem:[#allocation14 + $0x8] sm:$0xff] }
  0x93   : > { %1251 = vmatpush.msra.mxu0 %v1246_v55 }
  0x94   : > { %862 = vmatpush.msrb.mxu2 %v831_v51  ;;  %1274 = vmatpush.msra.mxu1 %v1247_v56 }
  0x95   : > { %1252 = vmatpush.msra.mxu0 %v1244_v57 }
  0x96   : > { %1275 = vmatpush.msra.mxu1 %v1245_v58 }
  0x97   : > { %1253 = vmatpush.msra.mxu0 %v1242_v60 }
  0x98   : > { %1276 = vmatpush.msra.mxu1 %v1243_v61 }
  0x99   : > { %1254 = vmatpush.msra.mxu0 %v1240_v0 }
  0x9a   : > { %1277 = vmatpush.msra.mxu1 %v1241_v1 }
  0x9b   : > { %1255 = vmatpush.msra.mxu0 %v1238_v4 }
  0x9c   : > { %1278 = vmatpush.msra.mxu1 %v1239_v5 }
  0x9d   : > { %1256 = vmatpush.msra.mxu0 %v1236_v9 }
  0x9e   : > { %1279 = vmatpush.msra.mxu1 %v1237_v7 }
  0x9f   : > { %1257 = vmatpush.msra.mxu0 %v1234_v12 }
  0xa0   : > { %1280 = vmatpush.msra.mxu1 %v1235_v11 }
  0xa1   : > { %1258 = vmatpush.msra.mxu0 %v1232_v17 }
  0xa2   : > { %1281 = vmatpush.msra.mxu1 %v1233_v15 }
  0xa3   : > { %1259 = vmatpush.msra.mxu0 %v1230_v21 }
  0xa4   : > { %1282 = vmatpush.msra.mxu1 %v1231_v19 }
  0xa5   : > { %1260 = vmatpush.msra.mxu0 %v1228_v24 }
  0xa6   : > { %1283 = vmatpush.msra.mxu1 %v1229_v22 }
  0xa7   : > { %1261 = vmatpush.msra.mxu0 %v1226_v31 }
  0xa8   : > { %1284 = vmatpush.msra.mxu1 %v1227_v26 }
  0xa9   : > { %1262 = vmatpush.msra.mxu0 %v1224_v39 }
  0xaa   : > { %1285 = vmatpush.msra.mxu1 %v1225_v40  ;;  %v2450_v40 = vld [vmem:[#allocation10] sm:$0xff] }
  0xab   : > { %1263 = vmatpush.msra.mxu0 %v1222_v41  ;;  %v912_v41 = vperm.slane %v2450_v40, 1 }
  0xac   : > { %1286 = vmatpush.msra.mxu1 %v1223_v42 }
  0xad   : > { %1264 = vmatpush.msra.mxu0 %v1220_v44 }
  0xae   : > { %1287 = vmatpush.msra.mxu1 %v1221_v45 }
  0xaf   : > { %1265 = vmatpush.msra.mxu0 %v1218_v48  ;;  %v926_v48 = vperm.slane %v2450_v40, 3 }
  0xb0   : > { %1288 = vmatpush.msra.mxu1 %v1219_v49 }
  0xed   : > { %v639_v62 = vpop.f32.mrf.mxu0 }
  0xee   : > { %v662_v63 = vpop.f32.mrf.mxu1  ;;  %v640_v2 = vadd.f32 %v639_v62, %v618_v59 }
  0xf0   : > { %v663_v6 = vadd.f32 %v662_v63, %v640_v2 }
  0xf2   : > { %v2269_v8 = vmax.f32 %v663_v6, 0.0  ;;  %v1081_v6 = vadd.s32 2, %v2283_v25  ;;  %v889_v25 = vadd.s32 4294967294, %v2271_v10 }
  0xf4   : > { %785 = vmatmul.f32.vlgmr.msrb.gmra.mxu0 %v2269_v8  ;;  %v718_v27 = vrot.slane %v2269_v8, 7  ;;  %v815_v29 = vrot.slane %v2269_v8, 1  ;;  %vm1085_vm5 = vcmp.lt.s32.totalorder %v1081_v6, 16  ;;  %vm891_vm7 = vcmp.ge.s32.totalorder %v889_v25, 0 }
  0xf5   : > { %v642_v13 = vpop.f32.mrf.mxu0 }
  0xf6   : > { %v665_v14 = vpop.f32.mrf.mxu1  ;;  %v643_v16 = vadd.f32 %v642_v13, %v618_v59  ;;  %v685_v38 = vpop.f32.mrf.mxu2  ;;  %v1674_v59 = vld [vmem:[%s2573_s4] ss:$0 sm:$0xff] }
  0xf7   : > { %v686_v43 = vadd.f32 %v685_v38, %v619_v37 }
  0xf8   : > { %v666_v20 = vadd.f32 %v665_v14, %v643_v16 }
  0xfa   : > { %v2277_v23 = vmax.f32 %v666_v20, 0.0 }
  0xfc   : > { %788 = vmatmul.f32.gmra.mxu0 %v2277_v23  ;;  %v719_v28 = vrot.slane %v2277_v23, 7  ;;  %v816_v30 = vrot.slane %v2277_v23, 1 }
  0xfe   : > { %v724_v32 = vsel %vm722_vm0, %v719_v28, %v718_v27  ;;  %v818_v33 = vsel %vm817_vm2, %v815_v29, %v816_v30  ;;  %v723_v35 = vsel %vm722_vm0, %v718_v27, %v719_v28  ;;  %v819_v36 = vsel %vm817_vm2, %v816_v30, %v815_v29  ;;  %v688_v51 = vpop.f32.mrf.mxu2 }
  0xff   : > { %1539 = vmatmul.msk.f32.vlgmr.msrb.gmra.mxu1 %vm728_vm1, %v724_v32  ;;  %863 = vmatmul.f32.vlgmr.msrb.gmra.mxu2 %v818_v33  ;;  %v689_v52 = vadd.f32 %v688_v51, %v619_v37 }
 0x100   : > { %v708_v46 = vpop.f32.mrf.mxu3 }
 0x101   : > { %v709_v47 = vadd.f32 %v708_v46, %v686_v43  ;;  %v903_v43 = vperm.slane %v2450_v40, 0 }
 0x103   : > { %v715_v50 = vmax.f32 %v709_v47, 0.0  ;;  %v917_v47 = vperm.slane %v2450_v40, 2 }
 0x105   : > { %1266 = vmatmul.f32.vlgmr.msra.gmra.mxu0 %v715_v50 }
 0x107   : > { %811 = vmatmul.f32.gmra.mxu1 %v723_v35  ;;  %1540 = vmatmul.msk.f32.gmra.mxu2 %vm825_vm3, %v819_v36 }
 0x108   : > { %v711_v53 = vpop.f32.mrf.mxu3 }
 0x109   : > { %v712_v54 = vadd.f32 %v711_v53, %v689_v52  ;;  %v935_v53 = vperm.slane %v2450_v40, 4 }
 0x10b   : > { %v717_v55 = vmax.f32 %v712_v54, 0.0 }
 0x10d   : > { %1269 = vmatmul.f32.gmra.mxu0 %v717_v55 }
 0x10f   : > { %1289 = vmatmul.f32.vlgmr.msra.gmra.mxu1 %v715_v50 }
 0x117   : > { %1292 = vmatmul.f32.gmra.mxu1 %v717_v55 }
 0x171   : > { %v786_v57 = vpop.f32.mrf.mxu0 }
 0x179   : > { %v789_v1 = vpop.f32.mrf.mxu0 }
 0x17c   : > { %v809_v56 = vpop.f32.mrf.mxu1 }
 0x17d   : > { %v810_v58 = vadd.f32 %v809_v56, %v786_v57  ;;  %v950_v56 = vperm.slane %v2450_v40, 5 }
 0x182   : > { %v864_v60 = vpop.f32.mrf.mxu2 }
 0x183   : > { %v870_v61 = vadd.f32 %v864_v60, %v810_v58 }
 0x184   : > { %v812_v63 = vpop.f32.mrf.mxu1 }
 0x185   : > { %v876_v62 = vadd.f32 %v1674_v59, %v870_v61  ;;  %v813_v2 = vadd.f32 %v812_v63, %v789_v1  ;;  %v964_v63 = vperm.slane %v2450_v40, 7 }
 0x187   : > { %v2310_v0 = vmax.f32 %v876_v62, 0.0 }
 0x189   : > { %996 = vrot.lane.b32.xlu0 %v2310_v0, %s2013_s13  ;;  %987 = vrot.lane.b32.xlu2 %v2310_v0, %s2014_s17  ;;  %v1075_v11 = vrot.slane %v2310_v0, 2  ;;  %v884_v15 = vrot.slane %v2310_v0, 6  ;;  %v940_v17 = vrot.slane %v2310_v0, 7  ;;  %v1028_v22 = vrot.slane %v2310_v0, 1 }
 0x18a   : > { %v867_v3 = vpop.f32.mrf.mxu2 }
 0x18b   : > { %v871_v4 = vadd.f32 %v867_v3, %v813_v2  ;;  %v2465_v2 = vld [vmem:[#allocation10 + $0x8] sm:$0xff] }
 0x18c   : > { %v982_v6 = vperm.slane %v2465_v2, 1  ;;  %v1000_v25 = vperm.slane %v2465_v2, 3 }
 0x18d   : > { %v877_v5 = vadd.f32 %v1674_v59, %v871_v4  ;;  %v959_v59 = vperm.slane %v2450_v40, 6  ;;  %v973_v4 = vperm.slane %v2465_v2, 0 }
 0x18f   : > { %v2317_v7 = vmax.f32 %v877_v5, 0.0 }
 0x191   : > { %1010 = vrot.lane.b32.xlu0 %v2310_v0, %s2015_s30  ;;  %1019 = vrot.lane.b32.xlu2 %v2310_v0, %s2016_s14  ;;  %v1076_v9 = vrot.slane %v2317_v7, 2  ;;  %v885_v12 = vrot.slane %v2317_v7, 6  ;;  %v941_v13 = vrot.slane %v2317_v7, 7  ;;  %v1029_v21 = vrot.slane %v2317_v7, 1 }
 0x192   : > { %989 = vrot.lane.b32.xlu1 %v2317_v7, %s2014_s17 }
 0x193   : > { %v1079_v14 = vsel %vm1077_vm4, %v1076_v9, %v1075_v11  ;;  %v2339_v19 = vsel %vm886_vm6, %v884_v15, %v885_v12  ;;  %v2345_v20 = vsel %vm722_vm0, %v940_v17, %v941_v13  ;;  %v2361_v24 = vsel %vm817_vm2, %v1028_v22, %v1029_v21 }
 0x194   : > { %v2334_v16 = vsel %vm1085_vm5, %v1079_v14, 0.0  ;;  %v888_v26 = vsel %vm886_vm6, %v885_v12, %v884_v15  ;;  %v943_v28 = vsel %vm722_vm0, %v941_v13, %v940_v17  ;;  %v1031_v18 = vsel %vm817_vm2, %v1029_v21, %v1028_v22 }
 0x195   : > { %v2372_v27 = vsel %vm891_vm7, %v888_v26, 0.0  ;;  %v2390_v29 = vsel %vm728_vm1, %v943_v28, 0.0  ;;  %v2408_v30 = vsel %vm1077_vm4, %v1075_v11, %v1076_v9  ;;  %v2412_v31 = vsel %vm825_vm3, %v1031_v18, 0.0  ;;  %v1154_v18 = vld [vmem:[#allocation11 + $0x78] sm:$0xff] }
 0x196   : > { %v919_v51 = vmul.f32 %v917_v47, %v2339_v19  ;;  %v966_v9 = vmul.f32 %v964_v63, %v2345_v20  ;;  %1159 = vmatpush.msrb.mxu3 %v1154_v18  ;;  %v1141_v18 = vld [vmem:[#allocation11 + $0x10] sm:$0xff] }
 0x199   : > { %998 = vrot.lane.b32.xlu0 %v2317_v7, %s2013_s13  ;;  %901 = vrot.lane.b32.xlu2 %v2339_v19, %s2014_s17 }
 0x19a   : > { %957 = vrot.lane.b32.xlu1 %v2345_v20, %s2013_s13 }
 0x1a1   : > { %1012 = vrot.lane.b32.xlu0 %v2317_v7, %s2015_s30  ;;  %910 = vrot.lane.b32.xlu2 %v2339_v19, %s2013_s13 }
 0x1a2   : > { %971 = vrot.lane.b32.xlu1 %v2345_v20, %s2015_s30 }
 0x1a9   : > { %933 = vrot.lane.b32.xlu0 %v2339_v19, %s2016_s14  ;;  %924 = vrot.lane.b32.xlu2 %v2339_v19, %s2015_s30  ;;  %v991_v19 = vperm.slane %v2465_v2, 2 }
 0x1aa   : > { %1034 = vrot.lane.b32.xlu1 %v2361_v24, %s2014_s17 }
 0x1b1   : > { %899 = vrot.lane.b32.xlu0 %v2372_v27, %s2014_s17  ;;  %948 = vrot.lane.b32.xlu2 %v2345_v20, %s2014_s17 }
 0x1b2   : > { %922 = vrot.lane.b32.xlu1 %v2372_v27, %s2015_s30 }
 0x1b9   : > { %908 = vrot.lane.b32.xlu0 %v2372_v27, %s2013_s13  ;;  %980 = vrot.lane.b32.xlu2 %v2345_v20, %s2016_s14  ;;  %v1153_v20 = vld [vmem:[#allocation11 + $0x70] sm:$0xff] }
 0x1ba   : > { %931 = vrot.lane.b32.xlu1 %v2372_v27, %s2016_s14  ;;  %1160 = vmatpush.msrb.mxu3 %v1153_v20 }
 0x1c1   : > { %946 = vrot.lane.b32.xlu0 %v2390_v29, %s2014_s17  ;;  %1043 = vrot.lane.b32.xlu2 %v2361_v24, %s2013_s13 }
 0x1c2   : > { %955 = vrot.lane.b32.xlu1 %v2390_v29, %s2013_s13 }
 0x1c9   : > { %978 = vrot.lane.b32.xlu0 %v2390_v29, %s2016_s14  ;;  %1057 = vrot.lane.b32.xlu2 %v2361_v24, %s2015_s30 }
 0x1ca   : > { %969 = vrot.lane.b32.xlu1 %v2390_v29, %s2015_s30 }
 0x1d1   : > { %1090 = vrot.lane.b32.xlu0 %v2408_v30, %s2014_s17  ;;  %1045 = vrot.lane.b32.xlu2 %v2412_v31, %s2013_s13 }
 0x1d2   : > { %1021 = vrot.lane.b32.xlu1 %v2317_v7, %s2016_s14 }
 0x1d9   : > { %1036 = vrot.lane.b32.xlu0 %v2412_v31, %s2014_s17  ;;  %1059 = vrot.lane.b32.xlu2 %v2412_v31, %s2015_s30 }
 0x1da   : > { %1066 = vrot.lane.b32.xlu1 %v2361_v24, %s2016_s14 }
 0x1e1   : > { %1068 = vrot.lane.b32.xlu0 %v2412_v31, %s2016_s14  ;;  %1092 = vrot.lane.b32.xlu2 %v2334_v16, %s2014_s17 }
 0x1e2   : > { %1099 = vrot.lane.b32.xlu1 %v2408_v30, %s2013_s13 }
 0x1e3   : > { %v2432_v10 = vpop.permute.xlu2 %987 }
 0x1e9   : > { %1122 = vrot.lane.b32.xlu0 %v2408_v30, %s2016_s14  ;;  %1115 = vrot.lane.b32.xlu2 %v2334_v16, %s2015_s30 }
 0x1ea   : > { %1113 = vrot.lane.b32.xlu1 %v2408_v30, %s2015_s30 }
 0x1eb   : > { %v2440_v32 = vpop.permute.xlu2 %1019 }
 0x1f1   : > { %1124 = vrot.lane.b32.xlu0 %v2334_v16, %s2016_s14  ;;  %s2607_s14 = sld [smem:[#allocation29_spill]] }
 0x1f2   : > { %1101 = vrot.lane.b32.xlu1 %v2334_v16, %s2013_s13 }
 0x1f3   : > { %v902_v33 = vpop.permute.xlu2 %901 }
 0x1f4   : > { %v905_v46 = vmul.f32 %v903_v43, %v902_v33 }
 0x1f7   : > { %s1372_s16 = scalar_lea.hbm %s2607_s14, %s1547_s25  ;;  %s1938_s5 = scalar_lea.hbm %s2607_s14, 64 }
 0x1f8   : > { %s1375_s8 = sshll.u32 %s1372_s16, 4  ;;  %s1376_s8 = int_to_ptr.hbm [resolvable:$true] %s1375_s8 }
 0x1f9   : > { %s1932_s2 = sshra.s32 %s1376_s8, 4  ;;  %s1933_s2 = int_to_ptr.hbm [resolvable:$true] %s1932_s2 }
 0x1fa   : > { %s1934_s27 = scalar_lea.hbm %s1933_s2, 32  ;;  %p1939_p12 = scmp.lt.s32.totalorder %s1933_s2, %s2607_s14 }
 0x1fb   : > { %v2446_v34 = vpop.permute.xlu0 %996  ;;  %v911_v37 = vpop.permute.xlu2 %910  ;;  %p1935_p1 = scmp.ne.s32.totalorder %s1933_s2, %s1934_s27  ;;  %p1940_p8 = scmp.lt.s32.totalorder %s1938_s5, %s1934_s27 }
 0x1fc   : > { %v914_v44 = vmul.f32 %v912_v41, %v911_v37  ;;  %v1001_v20 = vmul.f32 %v1000_v25, %v2446_v34 }
 0x1fd   : > { %p1936_p3 = pnand %p1935_p1, %p2188_p13  ;;  %p1941_p7 = por %p1940_p8, %p1939_p12 }
 0x1fe   : > { %v916_v50 = vadd.f32 %v914_v44, %v905_v46 }
 0x1ff   : > { %p1937_p5 = pneg %p1936_p3 }
 0x200   : > { %v921_v55 = vadd.f32 %v919_v51, %v916_v50  ;;  %v918_v50 = vmul.f32 %v917_v47, %v2372_v27  ;;  %v1147_v47 = vld [vmem:[#allocation11 + $0x40] sm:$0xff] }
 0x201   : > { %p1942_p9 = pnand %p1941_p7, %p1937_p5 }
 0x203   : > { %v2448_v35 = vpop.permute.xlu0 %1010  ;;  %v925_v42 = vpop.permute.xlu2 %924 }
 0x204   : > { %v990_v36 = vpop.permute.xlu1 %989  ;;  %v928_v52 = vmul.f32 %v926_v48, %v925_v42 }
 0x205   : > { %v993_v26 = vmul.f32 %v991_v19, %v990_v36 }
 0x206   : > { %v930_v58 = vadd.f32 %v928_v52, %v921_v55  ;;  %v1151_v52 = vld [vmem:[#allocation11 + $0x60] sm:$0xff]  ;;  %v1150_v55 = vld [vmem:[#allocation11 + $0x58] sm:$0xff] }
 0x20b   : > { %v999_v38 = vpop.permute.xlu0 %998  ;;  %v949_v54 = vpop.permute.xlu2 %948 }
 0x20c   : > { %v958_v39 = vpop.permute.xlu1 %957  ;;  %v952_v62 = vmul.f32 %v950_v56, %v949_v54  ;;  %v1002_v33 = vmul.f32 %v1000_v25, %v999_v38 }
 0x20d   : > { %v961_v3 = vmul.f32 %v959_v59, %v958_v39  ;;  %v1152_v39 = vld [vmem:[#allocation11 + $0x68] sm:$0xff] }
 0x20e   : > { %1161 = vmatpush.msrb.mxu3 %v1152_v39  ;;  %v1140_v39 = vld [vmem:[#allocation11 + $0x8] sm:$0xff] }
 0x210   : > { %1162 = vmatpush.msrb.mxu3 %v1151_v52 }
 0x212   : > { %1163 = vmatpush.msrb.mxu3 %v1150_v55 }
 0x213   : > { %v2454_v45 = vpop.permute.xlu0 %1012  ;;  %v981_v12 = vpop.permute.xlu2 %980 }
 0x214   : > { %v972_v49 = vpop.permute.xlu1 %971  ;;  %v984_v21 = vmul.f32 %v982_v6, %v981_v12 }
 0x215   : > { %v975_v14 = vmul.f32 %v973_v4, %v972_v49 }
 0x21b   : > { %v934_v57 = vpop.permute.xlu0 %933 }
 0x21c   : > { %v2462_v60 = vpop.permute.xlu1 %1034  ;;  %v937_v61 = vmul.f32 %v935_v53, %v934_v57 }
 0x21e   : > { %v939_v1 = vadd.f32 %v937_v61, %v930_v58  ;;  %v2479_v58 = vpop.permute.xlu2 %1043 }
 0x220   : > { %v954_v5 = vadd.f32 %v952_v62, %v939_v1 }
 0x222   : > { %v963_v11 = vadd.f32 %v961_v3, %v954_v5  ;;  %v1148_v3 = vld [vmem:[#allocation11 + $0x48] sm:$0xff] }
 0x223   : > { %v900_v13 = vpop.permute.xlu0 %899 }
 0x224   : > { %v968_v15 = vadd.f32 %v966_v9, %v963_v11  ;;  %v923_v17 = vpop.permute.xlu1 %922  ;;  %v904_v42 = vmul.f32 %v903_v43, %v900_v13  ;;  %v1149_v43 = vld [vmem:[#allocation11 + $0x50] sm:$0xff]  ;;  %v965_v9 = vmul.f32 %v964_v63, %v2390_v29  ;;  %v992_v29 = vmul.f32 %v991_v19, %v2432_v10 }
 0x225   : > { %v927_v36 = vmul.f32 %v926_v48, %v923_v17  ;;  %1164 = vmatpush.msrb.mxu3 %v1149_v43  ;;  %v1145_v11 = vld [vmem:[#allocation11 + $0x30] sm:$0xff]  ;;  %v1005_v63 = vperm.slane %v2465_v2, 4 }
 0x226   : > { %v977_v22 = vadd.f32 %v975_v14, %v968_v15  ;;  %v1144_v14 = vld [vmem:[#allocation11 + $0x28] sm:$0xff]  ;;  %v1058_v17 = vpop.permute.xlu2 %1057 }
 0x227   : > { %1165 = vmatpush.msrb.mxu3 %v1148_v3 }
 0x228   : > { %v986_v28 = vadd.f32 %v984_v21, %v977_v22  ;;  %v1143_v22 = vld [vmem:[#allocation11 + $0x20] sm:$0xff] }
 0x229   : > { %1166 = vmatpush.msrb.mxu3 %v1147_v47 }
 0x22a   : > { %v995_v37 = vadd.f32 %v993_v26, %v986_v28  ;;  %v1142_v28 = vld [vmem:[#allocation11 + $0x18] sm:$0xff] }
 0x22b   : > { %v909_v40 = vpop.permute.xlu0 %908 }
 0x22c   : > { %v932_v44 = vpop.permute.xlu1 %931  ;;  %v913_v46 = vmul.f32 %v912_v41, %v909_v40  ;;  %v2476_v49 = vadd.f32 %v1002_v33, %v995_v37  ;;  %v1014_v33 = vperm.slane %v2465_v2, 5 }
 0x22d   : > { %v936_v57 = vmul.f32 %v935_v53, %v932_v44  ;;  %v1146_v53 = vld [vmem:[#allocation11 + $0x38] sm:$0xff]  ;;  %v1038_v44 = vperm.slane %v2465_v2, 7 }
 0x22e   : > { %v915_v51 = vadd.f32 %v913_v46, %v904_v42  ;;  %1167 = vmatpush.msrb.mxu3 %v1146_v53  ;;  %v1006_v42 = vmul.f32 %v1005_v63, %v2310_v0  ;;  %v1015_v19 = vmul.f32 %v1014_v33, %v2448_v35  ;;  %v2494_v46 = vld [vmem:[#allocation10 + $0x10] sm:$0xff]  ;;  %v1046_v34 = vpop.permute.xlu2 %1045  ;;  %v1016_v35 = vmul.f32 %v1014_v33, %v2454_v45  ;;  %v1210_v33 = vld [vmem:[#allocation13 + $0xc0] sm:$0xff] }
 0x22f   : > { %v1052_v55 = vperm.slane %v2494_v46, 1 }
 0x230   : > { %v920_v54 = vadd.f32 %v918_v50, %v915_v51  ;;  %1168 = vmatpush.msrb.mxu3 %v1145_v11  ;;  %v1007_v50 = vmul.f32 %v1005_v63, %v2317_v7  ;;  %v1139_v51 = vld [vmem:[#allocation11] sm:$0xff]  ;;  %v1061_v7 = vperm.slane %v2494_v46, 2  ;;  %v1213_v63 = vld [vmem:[#allocation13 + $0xd8] sm:$0xff] }
 0x232   : > { %v929_v38 = vadd.f32 %v927_v36, %v920_v54  ;;  %1169 = vmatpush.msrb.mxu3 %v1144_v14  ;;  %v1047_v36 = vperm.slane %v2494_v46, 0  ;;  %v1009_v0 = vadd.f32 %v1007_v50, %v2476_v49  ;;  %v1053_v49 = vmul.f32 %v1052_v55, %v2361_v24  ;;  %v1216_v14 = vld [vmem:[#allocation13 + $0xf0] sm:$0xff]  ;;  %v1215_v24 = vld [vmem:[#allocation13 + $0xe8] sm:$0xff] }
 0x233   : > { %v947_v61 = vpop.permute.xlu0 %946  ;;  %v1062_v45 = vmul.f32 %v1061_v7, %v1058_v17  ;;  %1296 = vmatpush.msra.mxu2 %v1216_v14 }
 0x234   : > { %v956_v62 = vpop.permute.xlu1 %955  ;;  %v938_v41 = vadd.f32 %v936_v57, %v929_v38  ;;  %v951_v1 = vmul.f32 %v950_v56, %v947_v61  ;;  %1170 = vmatpush.msrb.mxu3 %v1143_v22  ;;  %v1049_v53 = vmul.f32 %v1047_v36, %v1046_v34  ;;  %v1675_v34 = vld [vmem:[#allocation10 + $0x18] ss:$0 sm:$0xff] }
 0x235   : > { %v960_v5 = vmul.f32 %v959_v59, %v956_v62  ;;  %v1048_v62 = vmul.f32 %v1047_v36, %v2479_v58  ;;  %v1103_v58 = vperm.slane %v2494_v46, 5 }
 0x236   : > { %v953_v27 = vadd.f32 %v951_v1, %v938_v41  ;;  %1171 = vmatpush.msrb.mxu3 %v1142_v28  ;;  %v1060_v47 = vpop.permute.xlu2 %1059 }
 0x238   : > { %v962_v48 = vadd.f32 %v960_v5, %v953_v27  ;;  %1172 = vmatpush.msrb.mxu3 %v1141_v18  ;;  %v1070_v5 = vperm.slane %v2494_v46, 3  ;;  %v1054_v18 = vmul.f32 %v1052_v55, %v2412_v31  ;;  %v1206_v31 = vld [vmem:[#allocation13 + $0xa0] sm:$0xff]  ;;  %v1204_v55 = vld [vmem:[#allocation13 + $0x90] sm:$0xff] }
 0x23a   : > { %v967_v12 = vadd.f32 %v965_v9, %v962_v48  ;;  %1173 = vmatpush.msrb.mxu3 %v1140_v39  ;;  %v1094_v9 = vperm.slane %v2494_v46, 4 }
 0x23b   : > { %v979_v13 = vpop.permute.xlu0 %978 }
 0x23c   : > { %v970_v15 = vpop.permute.xlu1 %969  ;;  %v983_v21 = vmul.f32 %v982_v6, %v979_v13  ;;  %v1023_v6 = vperm.slane %v2465_v2, 6  ;;  %1174 = vmatpush.msrb.mxu3 %v1139_v51  ;;  %v1039_v2 = vmul.f32 %v1038_v44, %v2462_v60 }
 0x23d   : > { %v974_v56 = vmul.f32 %v973_v4, %v970_v15  ;;  %v1217_v15 = vld [vmem:[#allocation13 + $0xf8] sm:$0xff] }
 0x23e   : > { %v1024_v52 = vmul.f32 %v1023_v6, %v2440_v32  ;;  %v1018_v32 = vadd.f32 %v1016_v35, %v1009_v0  ;;  %1319 = vmatpush.msra.mxu3 %v1217_v15  ;;  %v1205_v35 = vld [vmem:[#allocation13 + $0x98] sm:$0xff] }
 0x23f   : > { %v976_v59 = vadd.f32 %v974_v56, %v967_v12  ;;  %v1214_v56 = vld [vmem:[#allocation13 + $0xe0] sm:$0xff] }
 0x240   : > { %1297 = vmatpush.msra.mxu2 %v1214_v56  ;;  %1320 = vmatpush.msra.mxu3 %v1215_v24 }
 0x241   : > { %v985_v26 = vadd.f32 %v983_v21, %v976_v59 }
 0x242   : > { %1321 = vmatpush.msra.mxu3 %v1213_v63  ;;  %v1188_v63 = vld [vmem:[#allocation13 + $0x10] sm:$0xff] }
 0x243   : > { %v994_v4 = vadd.f32 %v992_v29, %v985_v26  ;;  %v1091_v37 = vpop.permute.xlu0 %1090  ;;  %v1212_v29 = vld [vmem:[#allocation13 + $0xd0] sm:$0xff] }
 0x244   : > { %v1022_v40 = vpop.permute.xlu1 %1021  ;;  %v1095_v17 = vmul.f32 %v1094_v9, %v1091_v37  ;;  %1298 = vmatpush.msra.mxu2 %v1212_v29  ;;  %v1191_v29 = vld [vmem:[#allocation13 + $0x28] sm:$0xff] }
 0x245   : > { %v1003_v10 = vadd.f32 %v1001_v20, %v994_v4  ;;  %v1025_v57 = vmul.f32 %v1023_v6, %v1022_v40  ;;  %v1108_v20 = vperm.slane %v2494_v46, 6  ;;  %v1211_v4 = vld [vmem:[#allocation13 + $0xc8] sm:$0xff]  ;;  %v1208_v40 = vld [vmem:[#allocation13 + $0xb0] sm:$0xff]  ;;  %v1209_v6 = vld [vmem:[#allocation13 + $0xb8] sm:$0xff] }
 0x246   : > { %1299 = vmatpush.msra.mxu2 %v1210_v33  ;;  %1322 = vmatpush.msra.mxu3 %v1211_v4 }
 0x247   : > { %v1008_v25 = vadd.f32 %v1006_v42, %v1003_v10  ;;  %v1027_v3 = vadd.f32 %v1025_v57, %v1018_v32  ;;  %v1063_v42 = vmul.f32 %v1061_v7, %v1060_v47  ;;  %v1093_v10 = vpop.permute.xlu2 %1092  ;;  %v1201_v32 = vld [vmem:[#allocation13 + $0x78] sm:$0xff] }
 0x248   : > { %1300 = vmatpush.msra.mxu2 %v1208_v40  ;;  %1323 = vmatpush.msra.mxu3 %v1209_v6 }
 0x249   : > { %v1017_v54 = vadd.f32 %v1015_v19, %v1008_v25  ;;  %v1117_v19 = vperm.slane %v2494_v46, 7  ;;  %v1207_v25 = vld [vmem:[#allocation13 + $0xa8] sm:$0xff] }
 0x24a   : > { %1301 = vmatpush.msra.mxu2 %v1206_v31  ;;  %1324 = vmatpush.msra.mxu3 %v1207_v25 }
 0x24b   : > { %v1026_v38 = vadd.f32 %v1024_v52, %v1017_v54  ;;  %v1037_v61 = vpop.permute.xlu0 %1036 }
 0x24c   : > { %v1067_v43 = vpop.permute.xlu1 %1066  ;;  %v1040_v1 = vmul.f32 %v1038_v44, %v1037_v61  ;;  %v1109_v44 = vmul.f32 %v1108_v20, %v2408_v30  ;;  %v1676_v30 = vld [vmem:[%s2575_s6] ss:$0 sm:$0xff]  ;;  %v1203_v61 = vld [vmem:[#allocation13 + $0x88] sm:$0xff]  ;;  %1302 = vmatpush.msra.mxu2 %v1204_v55  ;;  %1325 = vmatpush.msra.mxu3 %v1205_v35 }
 0x24d   : > { %v1041_v41 = vadd.f32 %v1039_v2, %v1026_v38  ;;  %v1071_v12 = vmul.f32 %v1070_v5, %v1067_v43  ;;  %v1202_v38 = vld [vmem:[#allocation13 + $0x80] sm:$0xff] }
 0x24e   : > { %v1042_v48 = vadd.f32 %v1040_v1, %v1027_v3  ;;  %1303 = vmatpush.msra.mxu2 %v1202_v38  ;;  %1326 = vmatpush.msra.mxu3 %v1203_v61  ;;  %v1198_v3 = vld [vmem:[#allocation13 + $0x60] sm:$0xff] }
 0x24f   : > { %v1050_v27 = vadd.f32 %v1048_v62, %v1041_v41  ;;  %v1200_v62 = vld [vmem:[#allocation13 + $0x70] sm:$0xff]  ;;  %v1096_v41 = vmul.f32 %v1094_v9, %v1093_v10  ;;  %v1194_v9 = vld [vmem:[#allocation13 + $0x40] sm:$0xff] }
 0x250   : > { %v1051_v22 = vadd.f32 %v1049_v53, %v1042_v48  ;;  %1304 = vmatpush.msra.mxu2 %v1200_v62  ;;  %1327 = vmatpush.msra.mxu3 %v1201_v32  ;;  %v1197_v48 = vld [vmem:[#allocation13 + $0x58] sm:$0xff]  ;;  %v1116_v53 = vpop.permute.xlu2 %1115 }
 0x251   : > { %v1055_v60 = vadd.f32 %v1053_v49, %v1050_v27  ;;  %v1199_v49 = vld [vmem:[#allocation13 + $0x68] sm:$0xff]  ;;  %v1119_v15 = vmul.f32 %v1117_v19, %v1116_v53 }
 0x252   : > { %v1056_v37 = vadd.f32 %v1054_v18, %v1051_v22  ;;  %1305 = vmatpush.msra.mxu2 %v1198_v3  ;;  %1328 = vmatpush.msra.mxu3 %v1199_v49  ;;  %v1193_v22 = vld [vmem:[#allocation13 + $0x38] sm:$0xff]  ;;  %v1187_v18 = vld [vmem:[#allocation13 + $0x8] sm:$0xff] }
 0x253   : > { %v1064_v11 = vadd.f32 %v1062_v45, %v1055_v60  ;;  %v1069_v13 = vpop.permute.xlu0 %1068  ;;  %v1196_v60 = vld [vmem:[#allocation13 + $0x50] sm:$0xff] }
 0x254   : > { %v1100_v59 = vpop.permute.xlu1 %1099  ;;  %v1065_v52 = vadd.f32 %v1063_v42, %v1056_v37  ;;  %v1072_v36 = vmul.f32 %v1070_v5, %v1069_v13  ;;  %v1195_v13 = vld [vmem:[#allocation13 + $0x48] sm:$0xff]  ;;  %1306 = vmatpush.msra.mxu2 %v1196_v60  ;;  %1329 = vmatpush.msra.mxu3 %v1197_v48 }
 0x255   : > { %v1073_v21 = vadd.f32 %v1071_v12, %v1064_v11  ;;  %v1104_v28 = vmul.f32 %v1103_v58, %v1100_v59  ;;  %v1110_v11 = vmul.f32 %v1108_v20, %v2334_v16  ;;  %v1190_v16 = vld [vmem:[#allocation13 + $0x20] sm:$0xff]  ;;  %v1677_v20 = vld [vmem:[%s2605_s26] ss:$0 sm:$0xff] }
 0x256   : > { %v1074_v7 = vadd.f32 %v1072_v36, %v1065_v52  ;;  %1307 = vmatpush.msra.mxu2 %v1194_v9  ;;  %1330 = vmatpush.msra.mxu3 %v1195_v13 }
 0x257   : > { %v1097_v26 = vadd.f32 %v1095_v17, %v1073_v21  ;;  %v1192_v21 = vld [vmem:[#allocation13 + $0x30] sm:$0xff] }
 0x258   : > { %v1098_v27 = vadd.f32 %v1096_v41, %v1074_v7  ;;  %1308 = vmatpush.msra.mxu2 %v1192_v21  ;;  %1331 = vmatpush.msra.mxu3 %v1193_v22 }
 0x259   : > { %v1106_v39 = vadd.f32 %v1104_v28, %v1097_v26  ;;  %v1189_v26 = vld [vmem:[#allocation13 + $0x18] sm:$0xff]  ;;  %v1186_v28 = vld [vmem:[#allocation13] sm:$0xff] }
 0x25a   : > { %1309 = vmatpush.msra.mxu2 %v1190_v16  ;;  %1332 = vmatpush.msra.mxu3 %v1191_v29 }
 0x25b   : > { %v1123_v51 = vpop.permute.xlu0 %1122  ;;  %v1111_v54 = vadd.f32 %v1109_v44, %v1106_v39  ;;  %v1267_v44 = vpop.f32.mrf.mxu0 }
 0x25c   : > { %v1114_v50 = vpop.permute.xlu1 %1113  ;;  %v1127_v57 = vmul.f32 %v1675_v34, %v1123_v51  ;;  %1310 = vmatpush.msra.mxu2 %v1188_v63  ;;  %1333 = vmatpush.msra.mxu3 %v1189_v26 }
 0x25d   : > { %v1118_v0 = vmul.f32 %v1117_v19, %v1114_v50  ;;  %v1342_v19 = vld [vmem:[%s2606_s15] sm:$0x3] }
 0x25e   : > { %1311 = vmatpush.msra.mxu2 %v1186_v28  ;;  %1334 = vmatpush.msra.mxu3 %v1187_v18  ;;  %v1344_v31 = vperm.slane %v1342_v19, 0  ;;  %v1345_v25 = vperm.slane %v1342_v19, 1 }
 0x25f   : > { %v1120_v2 = vadd.f32 %v1118_v0, %v1111_v54 }
 0x261   : > { %v1129_v43 = vadd.f32 %v1127_v57, %v1120_v2 }
 0x263   : > { %v1135_v1 = vadd.f32 %v1676_v30, %v1129_v43  ;;  %v1125_v14 = vpop.permute.xlu0 %1124  ;;  %v1270_v55 = vpop.f32.mrf.mxu0 }
 0x264   : > { %v1102_v5 = vpop.permute.xlu1 %1101 }
 0x265   : > { %v1105_v45 = vmul.f32 %v1103_v58, %v1102_v5  ;;  %v1137_v47 = vmax.f32 %v1135_v1, 0.0  ;;  %v1128_v58 = vmul.f32 %v1675_v34, %v1125_v14  ;;  %v1290_v34 = vpop.f32.mrf.mxu1 }
 0x267   : > { %v1107_v12 = vadd.f32 %v1105_v45, %v1098_v27  ;;  %1175 = vmatmul.f32.vlgmr.msrb.gmra.mxu3 %v1137_v47 }
 0x269   : > { %v1112_v56 = vadd.f32 %v1110_v11, %v1107_v12 }
 0x26b   : > { %v1121_v46 = vadd.f32 %v1119_v15, %v1112_v56 }
 0x26d   : > { %v1130_v59 = vadd.f32 %v1128_v58, %v1121_v46  ;;  %v1293_v35 = vpop.f32.mrf.mxu1 }
 0x26f   : > { %v1136_v24 = vadd.f32 %v1676_v30, %v1130_v59 }
 0x271   : > { %v1138_v17 = vmax.f32 %v1136_v24, 0.0 }
 0x273   : > { %1178 = vmatmul.f32.gmra.mxu3 %v1138_v17 }
 0x2ea   : > { %v1176_v33 = vpop.f32.mrf.mxu3 }
 0x2eb   : > { %v1177_v4 = vadd.f32 %v1677_v20, %v1176_v33 }
 0x2ed   : > { %v1182_v39 = vmax.f32 %v1177_v4, 0.0 }
 0x2ef   : > { %v1184_v37 = vadd.f32 %v1182_v39, %v2269_v8 }
 0x2f1   : > { %1312 = vmatmul.f32.vlgmr.msra.gmra.mxu2 %v1184_v37  ;;  %1335 = vmatmul.f32.vlgmr.msra.gmra.mxu3 %v1184_v37 }
 0x2f6   : > { %v1179_v40 = vpop.f32.mrf.mxu3 }
 0x2f7   : > { %v1180_v6 = vadd.f32 %v1677_v20, %v1179_v40 }
 0x2f9   : > { %v1183_v42 = vmax.f32 %v1180_v6, 0.0 }
 0x2fb   : > { %v1185_v10 = vadd.f32 %v1183_v42, %v2277_v23 }
 0x2fd   : > { %1315 = vmatmul.f32.gmra.mxu2 %v1185_v10  ;;  %1338 = vmatmul.f32.gmra.mxu3 %v1185_v10 }
 0x374   : > { %v1313_v8 = vpop.f32.mrf.mxu2  ;;  %v1336_v50 = vpop.f32.mrf.mxu3 }
 0x375   : > { %v1314_v51 = vadd.f32 %v1313_v8, %v1267_v44  ;;  %v1337_v52 = vadd.f32 %v1336_v50, %v1290_v34 }
 0x377   : > { %v1348_v36 = vadd.f32 %v1344_v31, %v1314_v51  ;;  %v1349_v54 = vadd.f32 %v1345_v25, %v1337_v52 }
 0x379   : > { %v1352_v0 = vmax.f32 %v1348_v36, 0.0  ;;  %v1353_v23 = vmax.f32 %v1349_v54, 0.0 }
 0x37b   : > { %1356 = vst [vmem:[%s547_s29] sm:$0xff] %v1352_v0 }
 0x37c   : > { %1357 = vst [vmem:[%s547_s29 + $0x8] sm:$0xff] %v1353_v23 }
 0x380   : > { %v1316_v2 = vpop.f32.mrf.mxu2  ;;  %v1339_v57 = vpop.f32.mrf.mxu3 }
 0x381   : > { %v1317_v30 = vadd.f32 %v1316_v2, %v1270_v55  ;;  %v1340_v38 = vadd.f32 %v1339_v57, %v1293_v35 }
 0x383   : > { %v1350_v61 = vadd.f32 %v1344_v31, %v1317_v30  ;;  %v1351_v7 = vadd.f32 %v1345_v25, %v1340_v38 }
 0x385   : > { %v1354_v43 = vmax.f32 %v1350_v61, 0.0  ;;  %v1355_v62 = vmax.f32 %v1351_v7, 0.0 }
 0x387   : > { %1358 = vst [vmem:[%s547_s29 + $0x10] sm:$0xff] %v1354_v43 }
 0x388   : > { %1359 = vst [vmem:[%s547_s29 + $0x18] sm:$0xff] %v1355_v62 }
 0x389   : > { %1945 = shalt.err (!%p1942_p9)
}
 0x38a   : > { %s2017_s3 = smov 256  }
 0x38b   : > { %1578 = dma.vmem_to_hbm [thread:$0]  (%p2188_p13), %s1374_s18, 512, %s1376_s8, %s1361_s28, %s2017_s3, %s2017_s3, %s2014_s17  }
 0x38c PF: > { %s1390_s29 = sand.u32 1, %s1988_s21   ;;  %p2608_p10 = scmp.ge.s32.totalorder %s2000_s24, 2 }
 0x38d   : > { %s1391_s13 = scalar_lea.sflag [#allocation4], %s1390_s29 }
 0x38e   : > { %p1607_p11 = pnand %p2608_p10, %p2193_p4 }
 0x390   : > { %p1608_p0 = pneg %p1607_p11 }
 0x392   : > { %1983 = dma.done.wait (%p1608_p0), %s1391_s13, 512  }
 0x393   : > { %1985 = vsyncadd (%p1608_p0), %s1391_s13, 4294966784  ;;  %p29_p2 = scmp.ge.s32.totalorder %s2168_s19, 4   ;;  %s2609_s21 = smov %s1992_s22 }
 0x394   : > { %s2610_s22 = smov %s1996_s23  ;;  %s2611_s23 = smov %s2180_s11 }
 0x395   : > { %s2612_s24 = smov %s2168_s19  ;;  %31 = sbr.rel (!%p29_p2) target bundleno = 17 (0x11), region = 143 }
 0x39a   :  { %1397 = vsyncpa [#allocation3], 1 }
 0x39b   :  { %1399 = vsyncpa [#allocation3 + $0x1], 1 }
 0x39c   :  { %1400 = vsyncpa [#allocation6], 1 }
 0x39d   :  { %1401 = vsyncpa [#allocation9], 1 }
 0x39e   :  { %1402 = vsyncpa [#allocation12], 1 }
 0x39f   :  { %1403 = vsyncpa [#allocation15], 1 }
 0x3a0   :  { %1404 = vsyncpa [#allocation4], 1 }
 0x3a1   :  { %1406 = vsyncpa [#allocation4 + $0x1], 1 }

</bundles_post_ra>
